<compile_context>
chip_gen: v7x
topology: tpu7x:2x2x1
jax: 0.10.0
libtpu: 0.0.40
codegen_flags: <defaults>
</compile_context>

<pallas_src>
import jax
import jax.numpy as jnp
from jax.experimental import pallas as pl
from jax.experimental.pallas import tpu as pltpu


def _round_up(x, m):
    return ((x + m - 1) // m) * m


def _pack_factor(d):
    """Timesteps packed per 128-lane slab for a feature dim d."""
    if d < 128 and 128 % d == 0:
        return 128 // d
    return 1


# ----------------------------------------------------------------------------
# Generic batched matmul + bias:  out = x @ w + b   (w is pre-transposed).
# Used for the final Linear layer (vocab dim padded to a multiple of 128).
# ----------------------------------------------------------------------------
def _matmul_bias_kernel(x_ref, w_ref, b_ref, o_ref):
    o_ref[...] = (
        jnp.dot(x_ref[...], w_ref[...], preferred_element_type=jnp.float32)
        + b_ref[...]
    )


def matmul_bias(x, w, b, *, block_rows=512):
    """x: (N, K); w: (K, M) bf16; b: (1, M) f32  ->  (N, M) f32."""
    N, K = x.shape
    M = w.shape[1]
    x = x.astype(jnp.bfloat16)
    w = w.astype(jnp.bfloat16)
    b = b.astype(jnp.float32)

    # Row tile rounded to a multiple of 16 (bf16 sublane pack), not 8.
    bn = min(block_rows, _round_up(N, 16))
    Np = _round_up(N, bn)
    if Np != N:
        x = jnp.pad(x, ((0, Np - N), (0, 0)))

    cost = pl.CostEstimate(
        flops=int(2 * Np * K * M),
        transcendentals=0,
        bytes_accessed=int(Np * K * 2 + K * M * 2 + M * 4 + Np * M * 4),
    )
    out = pl.pallas_call(
        _matmul_bias_kernel,
        out_shape=jax.ShapeDtypeStruct((Np, M), jnp.float32),
        grid_spec=pltpu.PrefetchScalarGridSpec(
            num_scalar_prefetch=0,
            grid=(Np // bn,),
            in_specs=[
                pl.BlockSpec((bn, K), lambda i: (i, 0)),
                pl.BlockSpec((K, M), lambda i: (0, 0)),
                pl.BlockSpec((1, M), lambda i: (0, 0)),
            ],
            out_specs=pl.BlockSpec((bn, M), lambda i: (i, 0)),
        ),
        compiler_params=pltpu.CompilerParams(
            dimension_semantics=("parallel",),
            vmem_limit_bytes=64 * 1024 * 1024),
        cost_estimate=cost,
    )(x, w, b)
    return out[:N]


# ----------------------------------------------------------------------------
# Fused LSTM layer kernel: per grid step it
#   (1) computes the hoisted input projection for all TB timesteps of the
#       block with one MXU matmul (x_block @ W_ih^T + b), and
#   (2) runs the TB-step recurrence with only the small h @ W_hh^T matmul and
#       ONE full-128-lane sigmoid on the serial per-step chain.
# h/c live in f32 VMEM scratch carried across the sequential time grid axis.
# Gate order matches PyTorch nn.LSTM: i, f, g, o (g-gate columns pre-scaled).
# ----------------------------------------------------------------------------
def _lstm_fused_kernel(x_ref, wih_ref, whh_ref, b_ref, out_ref, h_ref, c_ref):
    # x_ref  : (Bb, TB, IN)           bf16   layer input block
    # wih_ref: (IN, 4H)               bf16   pre-transposed, g-cols pre-scaled
    # whh_ref: (H, 4H)                bf16   pre-transposed, g-cols pre-scaled
    # b_ref  : (1, 4H)                f32    b_ih + b_hh, g-cols pre-scaled
    # out_ref: (Bb, TB//P, P*H)       bf16   P timesteps packed per 128 lanes
    # h_ref, c_ref: (Bb, H)           f32    recurrent state
    @pl.when(pl.program_id(1) == 0)
    def _():
        h_ref[...] = jnp.zeros_like(h_ref)
        c_ref[...] = jnp.zeros_like(c_ref)

    Bb, tb, IN = x_ref.shape
    H = whh_ref.shape[0]
    H4 = 4 * H
    Go = out_ref.shape[1]
    P = tb // Go                       # timesteps packed per output slab

    wih = wih_ref[...]
    whh = whh_ref[...]
    bias = b_ref[...]                  # (1, 4H) f32

    # (1) Hoisted input projection for the whole block: one MXU matmul, off
    #     the serial recurrent chain (overlaps with the next block's x DMA).
    x = x_ref[...].reshape(Bb * tb, IN)
    xg = jnp.dot(x, wih, preferred_element_type=jnp.float32) + bias
    xg = xg.reshape(Bb, tb, H4)

    # (2) Recurrence. TB is a small static constant -> straight-line code.
    # TODO(synk): hold W_hh in the MXU across the time loop via
    # pltpu.matmul_push_rhs / matmul_acc_lhs / matmul_pop, and switch to
    # lax.fori_loop(..., unroll=8) once time_block is raised for long T.
    h = h_ref[...]
    c = c_ref[...]
    hs = []
    for t in range(tb):
        gates = xg[:, t, :] + jnp.dot(
            h.astype(whh.dtype), whh, preferred_element_type=jnp.float32)
        # Single full-128-lane EUP push: g-gate pre-activations were scaled by
        # 2 in the weights/bias, so tanh(x) = 2*sigmoid(2x) - 1.
        s = jax.nn.sigmoid(gates)
        i_g = s[:, 0 * H:1 * H]
        f_g = s[:, 1 * H:2 * H]
        g_g = 2.0 * s[:, 2 * H:3 * H] - 1.0
        o_g = s[:, 3 * H:4 * H]
        c = f_g * c + i_g * g_g
        h = o_g * jnp.tanh(c)
        hs.append(h)
    h_ref[...] = h
    c_ref[...] = c

    # Lane-dense writeback: pack P consecutive timesteps into one 128-lane
    # slab per store (unmasked vst instead of P masked 32-lane stores).
    for g in range(Go):
        slab = jnp.concatenate(hs[g * P:(g + 1) * P], axis=-1)
        out_ref[:, g, :] = slab.astype(out_ref.dtype)


def lstm_layer_forward(x_btf, layer, *, time_block=None, batch_block=None):
    """x_btf: (B, T, IN) -> (B, T, H) bf16 hidden states for every step."""
    B, T, IN = x_btf.shape
    w_ih_t = layer["w_ih_t"]        # (IN, 4H) bf16
    w_hh_t = layer["w_hh_t"]        # (H, 4H)  bf16
    bias = layer["bias"]            # (1, 4H)  f32
    H4 = w_ih_t.shape[1]
    H = H4 // 4

    p_out = _pack_factor(H)         # timesteps per 128-lane output slab

    # Choose the time block so that either the whole sequence is one block or
    # the block's packed group count (tb // p_out) is a multiple of 8.
    if time_block is None:
        time_block = 8 * p_out
    tb_target = _round_up(time_block, 8 * p_out)
    T1 = _round_up(T, p_out)
    tb = T1 if T1 <= tb_target else tb_target
    Tp = _round_up(T1, tb)
    # TODO(synk): pl.when-guard padded steps (t >= T) once time_block is large.

    x = x_btf.astype(jnp.bfloat16)
    if Tp != T:
        x = jnp.pad(x, ((0, 0), (0, Tp - T), (0, 0)))

    Bb = B if batch_block is None else batch_block   # set Bb=B//2 on v7x
    if Bb <= 0 or B % Bb != 0:
        Bb = B

    cost = pl.CostEstimate(
        flops=int(2 * B * Tp * IN * H4 + 2 * B * Tp * H * H4
                  + 10 * B * Tp * H4),
        transcendentals=int(B * Tp * (H4 + H)),
        bytes_accessed=int(B * Tp * IN * 2 + (IN + H) * H4 * 2 + H4 * 4
                           + B * Tp * H * 2),
    )
    out = pl.pallas_call(
        _lstm_fused_kernel,
        out_shape=jax.ShapeDtypeStruct((B, Tp // p_out, p_out * H),
                                       jnp.bfloat16),
        grid_spec=pltpu.PrefetchScalarGridSpec(
            num_scalar_prefetch=0,
            grid=(B // Bb, Tp // tb),          # (batch blocks, time blocks)
            in_specs=[
                pl.BlockSpec((Bb, tb, IN), lambda b, t: (b, t, 0)),
                pl.BlockSpec((IN, H4), lambda b, t: (0, 0)),
                pl.BlockSpec((H, H4), lambda b, t: (0, 0)),
                pl.BlockSpec((1, H4), lambda b, t: (0, 0)),
            ],
            out_specs=pl.BlockSpec((Bb, tb // p_out, p_out * H),
                                   lambda b, t: (b, t, 0)),
            scratch_shapes=[
                pltpu.VMEM((Bb, H), jnp.float32),   # h state
                pltpu.VMEM((Bb, H), jnp.float32),   # c state
            ],
        ),
        compiler_params=pltpu.CompilerParams(
            # batch axis independent (megacore-shardable on v7x); time axis is
            # a true recurrence and must stay sequential.
            dimension_semantics=("parallel", "arbitrary")),
        cost_estimate=cost,
    )(x, w_ih_t, w_hh_t, bias)

    out = out.reshape(B, Tp, H)      # free contiguous un-pack of the P slabs
    return out[:, :T, :]


# ----------------------------------------------------------------------------
# Full model forward (Pallas for LSTM layers + FC; glue in JAX).
# ----------------------------------------------------------------------------
def shakespeare_lstm_forward(tokens, prep, *, time_block=None,
                             batch_block=None):
    """tokens: (B, T) int32 -> logits (B, T, vocab_size), matching PyTorch."""
    # TODO(synk): embedding gather stays in XLA (jnp.take); no clean Pallas
    # win for a tiny (65, 32) table.
    x = jnp.take(prep["embedding"], tokens, axis=0)        # (B, T, E) f32
    B, T, _ = x.shape
    h = x
    for layer in prep["lstm"]:
        h = lstm_layer_forward(h, layer, time_block=time_block,
                               batch_block=batch_block)    # (B, T, H) bf16
    H = h.shape[-1]
    logits_p = matmul_bias(h.reshape(B * T, H),
                           prep["fc_w_t"], prep["fc_b_p"])  # (B*T, Vpad) f32
    V = prep["vocab_size"]
    return logits_p[:, :V].reshape(B, T, V)


# ----------------------------------------------------------------------------
# One-time parameter preparation: transpose, combine biases, pre-scale the
# g-gate columns by 2 (tanh(x) = 2*sigmoid(2x) - 1), cast, pad.
# ----------------------------------------------------------------------------
def _g_gate_scale(H, dtype):
    return jnp.concatenate([
        jnp.ones((2 * H,), dtype), 2.0 * jnp.ones((H,), dtype),
        jnp.ones((H,), dtype)])


def prepare_params(params):
    prep = {
        "embedding": params["embedding"].astype(jnp.float32),
        "vocab_size": int(params["fc_w"].shape[0]),
        "lstm": [],
    }
    for layer in params["lstm"]:
        H = layer["w_hh"].shape[1]
        scale = _g_gate_scale(H, jnp.float32)[None, :]          # (1, 4H)
        prep["lstm"].append({
            "w_ih_t": jnp.asarray(layer["w_ih"].T * scale, jnp.bfloat16),
            "w_hh_t": jnp.asarray(layer["w_hh"].T * scale, jnp.bfloat16),
            "bias": (layer["bias"] * scale).astype(jnp.float32),
        })
    V, H = params["fc_w"].shape
    Vp = _round_up(V, 128)
    prep["fc_w_t"] = jnp.pad(params["fc_w"].T,
                             ((0, 0), (0, Vp - V))).astype(jnp.bfloat16)
    prep["fc_b_p"] = jnp.pad(params["fc_b"],
                             ((0, 0), (0, Vp - V))).astype(jnp.float32)
    return prep


# ----------------------------------------------------------------------------
# Pure-JAX f32 reference (numerical sanity check, PyTorch semantics).
# ----------------------------------------------------------------------------
def reference_forward(tokens, params):
    x = jnp.take(params["embedding"], tokens, axis=0).astype(jnp.float32)
    B, T, _ = x.shape
    for layer in params["lstm"]:
        H = layer["w_hh"].shape[1]
        h = jnp.zeros((B, H), jnp.float32)
        c = jnp.zeros((B, H), jnp.float32)
        outs = []
        for t in range(T):
            gates = (x[:, t] @ layer["w_ih"].T + h @ layer["w_hh"].T
                     + layer["bias"][0])
            i_g = jax.nn.sigmoid(gates[:, 0 * H:1 * H])
            f_g = jax.nn.sigmoid(gates[:, 1 * H:2 * H])
            g_g = jnp.tanh(gates[:, 2 * H:3 * H])
            o_g = jax.nn.sigmoid(gates[:, 3 * H:4 * H])
            c = f_g * c + i_g * g_g
            h = o_g * jnp.tanh(c)
            outs.append(h)
        x = jnp.stack(outs, axis=1)
    return x @ params["fc_w"].T + params["fc_b"][0]


# ----------------------------------------------------------------------------
# Deterministic synthetic parameters (PyTorch layout / conventions).
# ----------------------------------------------------------------------------
def init_params(key, vocab_size, embed_size, hidden_size, num_layers):
    keys = jax.random.split(key, 3 + 4 * num_layers)
    params = {
        "embedding": 0.1 * jax.random.normal(
            keys[0], (vocab_size, embed_size), jnp.float32),
        "fc_w": 0.1 * jax.random.normal(
            keys[1], (vocab_size, hidden_size), jnp.float32),
        "fc_b": 0.1 * jax.random.normal(keys[2], (1, vocab_size), jnp.float32),
        "lstm": [],
    }
    for l in range(num_layers):
        in_size = embed_size if l == 0 else hidden_size
        k = keys[3 + 4 * l: 3 + 4 * (l + 1)]
        w_ih = 0.1 * jax.random.normal(k[0], (4 * hidden_size, in_size), jnp.float32)
        w_hh = 0.1 * jax.random.normal(k[1], (4 * hidden_size, hidden_size), jnp.float32)
        b_ih = 0.1 * jax.random.normal(k[2], (4 * hidden_size,), jnp.float32)
        b_hh = 0.1 * jax.random.normal(k[3], (4 * hidden_size,), jnp.float32)
        params["lstm"].append({
            "w_ih": w_ih,
            "w_hh": w_hh,
            "bias": (b_ih + b_hh)[None, :],   # PyTorch adds both biases
        })
    return params


if __name__ == "__main__":
    vocab_size, embed_size, hidden_size, num_layers = 65, 32, 32, 2
    batch, seq = 2, 8

    key = jax.random.PRNGKey(0)
    pkey, tkey = jax.random.split(key)
    params = init_params(pkey, vocab_size, embed_size, hidden_size, num_layers)
    prep = prepare_params(params)
    tokens = jax.random.randint(tkey, (batch, seq), 0, vocab_size, dtype=jnp.int32)

    logits = jax.block_until_ready(shakespeare_lstm_forward(tokens, prep))
    assert logits.shape == (batch, seq, vocab_size)

    ref = jax.block_until_ready(reference_forward(tokens, params))
    max_err = float(jnp.max(jnp.abs(logits - ref)))
    # bf16 matmul operands (f32 accumulation / f32 state) -> relaxed tolerance.
    assert jnp.allclose(logits, ref, atol=2e-2, rtol=2e-2), max_err

    print("KERNEL_OK")
</pallas_src>

<mosaic_0001>
module attributes {stable_mosaic.version = 11 : i64} {
  func.func @_lstm_fused_kernel(%arg0: i32, %arg1: i32, %arg2: memref<2x8x32xbf16, #tpu.memory_space<vmem>>, %arg3: memref<32x128xbf16, #tpu.memory_space<vmem>>, %arg4: memref<32x128xbf16, #tpu.memory_space<vmem>>, %arg5: memref<1x128xf32, #tpu.memory_space<vmem>>, %arg6: memref<2x2x128xbf16, #tpu.memory_space<vmem>>, %arg7: memref<2x32xf32, #tpu.memory_space<vmem>>, %arg8: memref<2x32xf32, #tpu.memory_space<vmem>>) attributes {dimension_semantics = [#tpu.dimension_semantics<parallel>, #tpu.dimension_semantics<arbitrary>], iteration_bounds = array<i64: 1, 1>, scalar_prefetch = 0 : i64, scratch_operands = 2 : i64, tpu.core_type = #tpu.core_type<tc>, window_params = [{transform_indices = @transform_0, window_bounds = array<i64: 2, 8, 32>}, {pipeline_mode = #tpu.pipeline_mode<synchronous>, transform_indices = @transform_1, window_bounds = array<i64: 32, 128>}, {pipeline_mode = #tpu.pipeline_mode<synchronous>, transform_indices = @transform_2, window_bounds = array<i64: 32, 128>}, {pipeline_mode = #tpu.pipeline_mode<synchronous>, transform_indices = @transform_3, window_bounds = array<i64: 1, 128>}, {transform_indices = @transform_4, window_bounds = array<i64: 2, 2, 128>}]} {
    %c0_i32 = arith.constant 0 : i32
    %0 = arith.cmpi eq, %arg1, %c0_i32 : i32
    %1 = arith.extui %0 : i1 to i32
    %c0_i32_0 = arith.constant 0 : i32
    %2 = arith.cmpi ne, %1, %c0_i32_0 : i32
    scf.if %2 {
      %cst_54 = arith.constant 0.000000e+00 : f32
      %210 = vector.broadcast %cst_54 : f32 to vector<2x32xf32>
      %c0_55 = arith.constant 0 : index
      %c0_56 = arith.constant 0 : index
      %211 = vector.load %arg7[%c0_55, %c0_56] : memref<2x32xf32, #tpu.memory_space<vmem>>, vector<2x32xf32>
      tpu.vector_store %arg7[%c0_55, %c0_56], %210 {strides = array<i32>} : memref<2x32xf32, #tpu.memory_space<vmem>>, vector<2x32xf32>,
      %cst_57 = arith.constant 0.000000e+00 : f32
      %212 = vector.broadcast %cst_57 : f32 to vector<2x32xf32>
      %c0_58 = arith.constant 0 : index
      %c0_59 = arith.constant 0 : index
      %213 = vector.load %arg8[%c0_58, %c0_59] : memref<2x32xf32, #tpu.memory_space<vmem>>, vector<2x32xf32>
      tpu.vector_store %arg8[%c0_58, %c0_59], %212 {strides = array<i32>} : memref<2x32xf32, #tpu.memory_space<vmem>>, vector<2x32xf32>,
    } else {
    }
    %c0 = arith.constant 0 : index
    %c0_1 = arith.constant 0 : index
    %3 = vector.load %arg3[%c0, %c0_1] : memref<32x128xbf16, #tpu.memory_space<vmem>>, vector<32x128xbf16>
    %c0_2 = arith.constant 0 : index
    %c0_3 = arith.constant 0 : index
    %4 = vector.load %arg4[%c0_2, %c0_3] : memref<32x128xbf16, #tpu.memory_space<vmem>>, vector<32x128xbf16>
    %c0_4 = arith.constant 0 : index
    %c0_5 = arith.constant 0 : index
    %5 = vector.load %arg5[%c0_4, %c0_5] : memref<1x128xf32, #tpu.memory_space<vmem>>, vector<1x128xf32>
    %c0_6 = arith.constant 0 : index
    %c0_7 = arith.constant 0 : index
    %c0_8 = arith.constant 0 : index
    %6 = vector.load %arg2[%c0_6, %c0_7, %c0_8] : memref<2x8x32xbf16, #tpu.memory_space<vmem>>, vector<2x8x32xbf16>
    %7 = vector.shape_cast %6 : vector<2x8x32xbf16> to vector<16x32xbf16>
    %cst = arith.constant dense<0.000000e+00> : vector<16x128xf32>
    %8 = tpu.matmul %7, %3, %cst {dimension_numbers = #tpu.dot_dimension_numbers<[1], [0], [0], [1], [0, 0, 1, 1], [], []>} : vector<16x32xbf16>, vector<32x128xbf16>, vector<16x128xf32> -> vector<16x128xf32>
    %9 = vector.broadcast %5 : vector<1x128xf32> to vector<16x128xf32>
    %10 = arith.addf %8, %9 : vector<16x128xf32>
    %11 = vector.shape_cast %10 : vector<16x128xf32> to vector<2x8x128xf32>
    %c0_9 = arith.constant 0 : index
    %c0_10 = arith.constant 0 : index
    %12 = vector.load %arg7[%c0_9, %c0_10] : memref<2x32xf32, #tpu.memory_space<vmem>>, vector<2x32xf32>
    %c0_11 = arith.constant 0 : index
    %c0_12 = arith.constant 0 : index
    %13 = vector.load %arg8[%c0_11, %c0_12] : memref<2x32xf32, #tpu.memory_space<vmem>>, vector<2x32xf32>
    %14 = vector.extract_strided_slice %11 {offsets = [0, 0, 0], sizes = [2, 1, 128], strides = [1, 1, 1]} : vector<2x8x128xf32> to vector<2x1x128xf32>
    %15 = vector.shape_cast %14 : vector<2x1x128xf32> to vector<2x128xf32>
    %16 = arith.truncf %12 : vector<2x32xf32> to vector<2x32xbf16>
    %cst_13 = arith.constant dense<0.000000e+00> : vector<2x128xf32>
    %17 = tpu.matmul %16, %4, %cst_13 {dimension_numbers = #tpu.dot_dimension_numbers<[1], [0], [0], [1], [0, 0, 1, 1], [], []>} : vector<2x32xbf16>, vector<32x128xbf16>, vector<2x128xf32> -> vector<2x128xf32>
    %18 = arith.addf %15, %17 : vector<2x128xf32>
    %19 = arith.negf %18 : vector<2x128xf32>
    %20 = math.exp %19 : vector<2x128xf32>
    %cst_14 = arith.constant 1.000000e+00 : f32
    %21 = vector.broadcast %cst_14 : f32 to vector<2x128xf32>
    %22 = arith.addf %21, %20 : vector<2x128xf32>
    %23 = arith.divf %21, %22 : vector<2x128xf32>
    %24 = vector.extract_strided_slice %23 {offsets = [0, 0], sizes = [2, 32], strides = [1, 1]} : vector<2x128xf32> to vector<2x32xf32>
    %25 = vector.extract_strided_slice %23 {offsets = [0, 32], sizes = [2, 32], strides = [1, 1]} : vector<2x128xf32> to vector<2x32xf32>
    %26 = vector.extract_strided_slice %23 {offsets = [0, 64], sizes = [2, 32], strides = [1, 1]} : vector<2x128xf32> to vector<2x32xf32>
    %cst_15 = arith.constant 2.000000e+00 : f32
    %27 = vector.broadcast %cst_15 : f32 to vector<2x32xf32>
    %28 = arith.mulf %27, %26 : vector<2x32xf32>
    %cst_16 = arith.constant 1.000000e+00 : f32
    %29 = vector.broadcast %cst_16 : f32 to vector<2x32xf32>
    %30 = arith.subf %28, %29 : vector<2x32xf32>
    %31 = vector.extract_strided_slice %23 {offsets = [0, 96], sizes = [2, 32], strides = [1, 1]} : vector<2x128xf32> to vector<2x32xf32>
    %32 = arith.mulf %25, %13 : vector<2x32xf32>
    %33 = arith.mulf %24, %30 : vector<2x32xf32>
    %34 = arith.addf %32, %33 : vector<2x32xf32>
    %35 = math.tanh %34 : vector<2x32xf32>
    %36 = arith.mulf %31, %35 : vector<2x32xf32>
    %37 = vector.extract_strided_slice %11 {offsets = [0, 1, 0], sizes = [2, 1, 128], strides = [1, 1, 1]} : vector<2x8x128xf32> to vector<2x1x128xf32>
    %38 = vector.shape_cast %37 : vector<2x1x128xf32> to vector<2x128xf32>
    %39 = arith.truncf %36 : vector<2x32xf32> to vector<2x32xbf16>
    %cst_17 = arith.constant dense<0.000000e+00> : vector<2x128xf32>
    %40 = tpu.matmul %39, %4, %cst_17 {dimension_numbers = #tpu.dot_dimension_numbers<[1], [0], [0], [1], [0, 0, 1, 1], [], []>} : vector<2x32xbf16>, vector<32x128xbf16>, vector<2x128xf32> -> vector<2x128xf32>
    %41 = arith.addf %38, %40 : vector<2x128xf32>
    %42 = arith.negf %41 : vector<2x128xf32>
    %43 = math.exp %42 : vector<2x128xf32>
    %cst_18 = arith.constant 1.000000e+00 : f32
    %44 = vector.broadcast %cst_18 : f32 to vector<2x128xf32>
    %45 = arith.addf %44, %43 : vector<2x128xf32>
    %46 = arith.divf %44, %45 : vector<2x128xf32>
    %47 = vector.extract_strided_slice %46 {offsets = [0, 0], sizes = [2, 32], strides = [1, 1]} : vector<2x128xf32> to vector<2x32xf32>
    %48 = vector.extract_strided_slice %46 {offsets = [0, 32], sizes = [2, 32], strides = [1, 1]} : vector<2x128xf32> to vector<2x32xf32>
    %49 = vector.extract_strided_slice %46 {offsets = [0, 64], sizes = [2, 32], strides = [1, 1]} : vector<2x128xf32> to vector<2x32xf32>
    %cst_19 = arith.constant 2.000000e+00 : f32
    %50 = vector.broadcast %cst_19 : f32 to vector<2x32xf32>
    %51 = arith.mulf %50, %49 : vector<2x32xf32>
    %cst_20 = arith.constant 1.000000e+00 : f32
    %52 = vector.broadcast %cst_20 : f32 to vector<2x32xf32>
    %53 = arith.subf %51, %52 : vector<2x32xf32>
    %54 = vector.extract_strided_slice %46 {offsets = [0, 96], sizes = [2, 32], strides = [1, 1]} : vector<2x128xf32> to vector<2x32xf32>
    %55 = arith.mulf %48, %34 : vector<2x32xf32>
    %56 = arith.mulf %47, %53 : vector<2x32xf32>
    %57 = arith.addf %55, %56 : vector<2x32xf32>
    %58 = math.tanh %57 : vector<2x32xf32>
    %59 = arith.mulf %54, %58 : vector<2x32xf32>
    %60 = vector.extract_strided_slice %11 {offsets = [0, 2, 0], sizes = [2, 1, 128], strides = [1, 1, 1]} : vector<2x8x128xf32> to vector<2x1x128xf32>
    %61 = vector.shape_cast %60 : vector<2x1x128xf32> to vector<2x128xf32>
    %62 = arith.truncf %59 : vector<2x32xf32> to vector<2x32xbf16>
    %cst_21 = arith.constant dense<0.000000e+00> : vector<2x128xf32>
    %63 = tpu.matmul %62, %4, %cst_21 {dimension_numbers = #tpu.dot_dimension_numbers<[1], [0], [0], [1], [0, 0, 1, 1], [], []>} : vector<2x32xbf16>, vector<32x128xbf16>, vector<2x128xf32> -> vector<2x128xf32>
    %64 = arith.addf %61, %63 : vector<2x128xf32>
    %65 = arith.negf %64 : vector<2x128xf32>
    %66 = math.exp %65 : vector<2x128xf32>
    %cst_22 = arith.constant 1.000000e+00 : f32
    %67 = vector.broadcast %cst_22 : f32 to vector<2x128xf32>
    %68 = arith.addf %67, %66 : vector<2x128xf32>
    %69 = arith.divf %67, %68 : vector<2x128xf32>
    %70 = vector.extract_strided_slice %69 {offsets = [0, 0], sizes = [2, 32], strides = [1, 1]} : vector<2x128xf32> to vector<2x32xf32>
    %71 = vector.extract_strided_slice %69 {offsets = [0, 32], sizes = [2, 32], strides = [1, 1]} : vector<2x128xf32> to vector<2x32xf32>
    %72 = vector.extract_strided_slice %69 {offsets = [0, 64], sizes = [2, 32], strides = [1, 1]} : vector<2x128xf32> to vector<2x32xf32>
    %cst_23 = arith.constant 2.000000e+00 : f32
    %73 = vector.broadcast %cst_23 : f32 to vector<2x32xf32>
    %74 = arith.mulf %73, %72 : vector<2x32xf32>
    %cst_24 = arith.constant 1.000000e+00 : f32
    %75 = vector.broadcast %cst_24 : f32 to vector<2x32xf32>
    %76 = arith.subf %74, %75 : vector<2x32xf32>
    %77 = vector.extract_strided_slice %69 {offsets = [0, 96], sizes = [2, 32], strides = [1, 1]} : vector<2x128xf32> to vector<2x32xf32>
    %78 = arith.mulf %71, %57 : vector<2x32xf32>
    %79 = arith.mulf %70, %76 : vector<2x32xf32>
    %80 = arith.addf %78, %79 : vector<2x32xf32>
    %81 = math.tanh %80 : vector<2x32xf32>
    %82 = arith.mulf %77, %81 : vector<2x32xf32>
    %83 = vector.extract_strided_slice %11 {offsets = [0, 3, 0], sizes = [2, 1, 128], strides = [1, 1, 1]} : vector<2x8x128xf32> to vector<2x1x128xf32>
    %84 = vector.shape_cast %83 : vector<2x1x128xf32> to vector<2x128xf32>
    %85 = arith.truncf %82 : vector<2x32xf32> to vector<2x32xbf16>
    %cst_25 = arith.constant dense<0.000000e+00> : vector<2x128xf32>
    %86 = tpu.matmul %85, %4, %cst_25 {dimension_numbers = #tpu.dot_dimension_numbers<[1], [0], [0], [1], [0, 0, 1, 1], [], []>} : vector<2x32xbf16>, vector<32x128xbf16>, vector<2x128xf32> -> vector<2x128xf32>
    %87 = arith.addf %84, %86 : vector<2x128xf32>
    %88 = arith.negf %87 : vector<2x128xf32>
    %89 = math.exp %88 : vector<2x128xf32>
    %cst_26 = arith.constant 1.000000e+00 : f32
    %90 = vector.broadcast %cst_26 : f32 to vector<2x128xf32>
    %91 = arith.addf %90, %89 : vector<2x128xf32>
    %92 = arith.divf %90, %91 : vector<2x128xf32>
    %93 = vector.extract_strided_slice %92 {offsets = [0, 0], sizes = [2, 32], strides = [1, 1]} : vector<2x128xf32> to vector<2x32xf32>
    %94 = vector.extract_strided_slice %92 {offsets = [0, 32], sizes = [2, 32], strides = [1, 1]} : vector<2x128xf32> to vector<2x32xf32>
    %95 = vector.extract_strided_slice %92 {offsets = [0, 64], sizes = [2, 32], strides = [1, 1]} : vector<2x128xf32> to vector<2x32xf32>
    %cst_27 = arith.constant 2.000000e+00 : f32
    %96 = vector.broadcast %cst_27 : f32 to vector<2x32xf32>
    %97 = arith.mulf %96, %95 : vector<2x32xf32>
    %cst_28 = arith.constant 1.000000e+00 : f32
    %98 = vector.broadcast %cst_28 : f32 to vector<2x32xf32>
    %99 = arith.subf %97, %98 : vector<2x32xf32>
    %100 = vector.extract_strided_slice %92 {offsets = [0, 96], sizes = [2, 32], strides = [1, 1]} : vector<2x128xf32> to vector<2x32xf32>
    %101 = arith.mulf %94, %80 : vector<2x32xf32>
    %102 = arith.mulf %93, %99 : vector<2x32xf32>
    %103 = arith.addf %101, %102 : vector<2x32xf32>
    %104 = math.tanh %103 : vector<2x32xf32>
    %105 = arith.mulf %100, %104 : vector<2x32xf32>
    %106 = vector.extract_strided_slice %11 {offsets = [0, 4, 0], sizes = [2, 1, 128], strides = [1, 1, 1]} : vector<2x8x128xf32> to vector<2x1x128xf32>
    %107 = vector.shape_cast %106 : vector<2x1x128xf32> to vector<2x128xf32>
    %108 = arith.truncf %105 : vector<2x32xf32> to vector<2x32xbf16>
    %cst_29 = arith.constant dense<0.000000e+00> : vector<2x128xf32>
    %109 = tpu.matmul %108, %4, %cst_29 {dimension_numbers = #tpu.dot_dimension_numbers<[1], [0], [0], [1], [0, 0, 1, 1], [], []>} : vector<2x32xbf16>, vector<32x128xbf16>, vector<2x128xf32> -> vector<2x128xf32>
    %110 = arith.addf %107, %109 : vector<2x128xf32>
    %111 = arith.negf %110 : vector<2x128xf32>
    %112 = math.exp %111 : vector<2x128xf32>
    %cst_30 = arith.constant 1.000000e+00 : f32
    %113 = vector.broadcast %cst_30 : f32 to vector<2x128xf32>
    %114 = arith.addf %113, %112 : vector<2x128xf32>
    %115 = arith.divf %113, %114 : vector<2x128xf32>
    %116 = vector.extract_strided_slice %115 {offsets = [0, 0], sizes = [2, 32], strides = [1, 1]} : vector<2x128xf32> to vector<2x32xf32>
    %117 = vector.extract_strided_slice %115 {offsets = [0, 32], sizes = [2, 32], strides = [1, 1]} : vector<2x128xf32> to vector<2x32xf32>
    %118 = vector.extract_strided_slice %115 {offsets = [0, 64], sizes = [2, 32], strides = [1, 1]} : vector<2x128xf32> to vector<2x32xf32>
    %cst_31 = arith.constant 2.000000e+00 : f32
    %119 = vector.broadcast %cst_31 : f32 to vector<2x32xf32>
    %120 = arith.mulf %119, %118 : vector<2x32xf32>
    %cst_32 = arith.constant 1.000000e+00 : f32
    %121 = vector.broadcast %cst_32 : f32 to vector<2x32xf32>
    %122 = arith.subf %120, %121 : vector<2x32xf32>
    %123 = vector.extract_strided_slice %115 {offsets = [0, 96], sizes = [2, 32], strides = [1, 1]} : vector<2x128xf32> to vector<2x32xf32>
    %124 = arith.mulf %117, %103 : vector<2x32xf32>
    %125 = arith.mulf %116, %122 : vector<2x32xf32>
    %126 = arith.addf %124, %125 : vector<2x32xf32>
    %127 = math.tanh %126 : vector<2x32xf32>
    %128 = arith.mulf %123, %127 : vector<2x32xf32>
    %129 = vector.extract_strided_slice %11 {offsets = [0, 5, 0], sizes = [2, 1, 128], strides = [1, 1, 1]} : vector<2x8x128xf32> to vector<2x1x128xf32>
    %130 = vector.shape_cast %129 : vector<2x1x128xf32> to vector<2x128xf32>
    %131 = arith.truncf %128 : vector<2x32xf32> to vector<2x32xbf16>
    %cst_33 = arith.constant dense<0.000000e+00> : vector<2x128xf32>
    %132 = tpu.matmul %131, %4, %cst_33 {dimension_numbers = #tpu.dot_dimension_numbers<[1], [0], [0], [1], [0, 0, 1, 1], [], []>} : vector<2x32xbf16>, vector<32x128xbf16>, vector<2x128xf32> -> vector<2x128xf32>
    %133 = arith.addf %130, %132 : vector<2x128xf32>
    %134 = arith.negf %133 : vector<2x128xf32>
    %135 = math.exp %134 : vector<2x128xf32>
    %cst_34 = arith.constant 1.000000e+00 : f32
    %136 = vector.broadcast %cst_34 : f32 to vector<2x128xf32>
    %137 = arith.addf %136, %135 : vector<2x128xf32>
    %138 = arith.divf %136, %137 : vector<2x128xf32>
    %139 = vector.extract_strided_slice %138 {offsets = [0, 0], sizes = [2, 32], strides = [1, 1]} : vector<2x128xf32> to vector<2x32xf32>
    %140 = vector.extract_strided_slice %138 {offsets = [0, 32], sizes = [2, 32], strides = [1, 1]} : vector<2x128xf32> to vector<2x32xf32>
    %141 = vector.extract_strided_slice %138 {offsets = [0, 64], sizes = [2, 32], strides = [1, 1]} : vector<2x128xf32> to vector<2x32xf32>
    %cst_35 = arith.constant 2.000000e+00 : f32
    %142 = vector.broadcast %cst_35 : f32 to vector<2x32xf32>
    %143 = arith.mulf %142, %141 : vector<2x32xf32>
    %cst_36 = arith.constant 1.000000e+00 : f32
    %144 = vector.broadcast %cst_36 : f32 to vector<2x32xf32>
    %145 = arith.subf %143, %144 : vector<2x32xf32>
    %146 = vector.extract_strided_slice %138 {offsets = [0, 96], sizes = [2, 32], strides = [1, 1]} : vector<2x128xf32> to vector<2x32xf32>
    %147 = arith.mulf %140, %126 : vector<2x32xf32>
    %148 = arith.mulf %139, %145 : vector<2x32xf32>
    %149 = arith.addf %147, %148 : vector<2x32xf32>
    %150 = math.tanh %149 : vector<2x32xf32>
    %151 = arith.mulf %146, %150 : vector<2x32xf32>
    %152 = vector.extract_strided_slice %11 {offsets = [0, 6, 0], sizes = [2, 1, 128], strides = [1, 1, 1]} : vector<2x8x128xf32> to vector<2x1x128xf32>
    %153 = vector.shape_cast %152 : vector<2x1x128xf32> to vector<2x128xf32>
    %154 = arith.truncf %151 : vector<2x32xf32> to vector<2x32xbf16>
    %cst_37 = arith.constant dense<0.000000e+00> : vector<2x128xf32>
    %155 = tpu.matmul %154, %4, %cst_37 {dimension_numbers = #tpu.dot_dimension_numbers<[1], [0], [0], [1], [0, 0, 1, 1], [], []>} : vector<2x32xbf16>, vector<32x128xbf16>, vector<2x128xf32> -> vector<2x128xf32>
    %156 = arith.addf %153, %155 : vector<2x128xf32>
    %157 = arith.negf %156 : vector<2x128xf32>
    %158 = math.exp %157 : vector<2x128xf32>
    %cst_38 = arith.constant 1.000000e+00 : f32
    %159 = vector.broadcast %cst_38 : f32 to vector<2x128xf32>
    %160 = arith.addf %159, %158 : vector<2x128xf32>
    %161 = arith.divf %159, %160 : vector<2x128xf32>
    %162 = vector.extract_strided_slice %161 {offsets = [0, 0], sizes = [2, 32], strides = [1, 1]} : vector<2x128xf32> to vector<2x32xf32>
    %163 = vector.extract_strided_slice %161 {offsets = [0, 32], sizes = [2, 32], strides = [1, 1]} : vector<2x128xf32> to vector<2x32xf32>
    %164 = vector.extract_strided_slice %161 {offsets = [0, 64], sizes = [2, 32], strides = [1, 1]} : vector<2x128xf32> to vector<2x32xf32>
    %cst_39 = arith.constant 2.000000e+00 : f32
    %165 = vector.broadcast %cst_39 : f32 to vector<2x32xf32>
    %166 = arith.mulf %165, %164 : vector<2x32xf32>
    %cst_40 = arith.constant 1.000000e+00 : f32
    %167 = vector.broadcast %cst_40 : f32 to vector<2x32xf32>
    %168 = arith.subf %166, %167 : vector<2x32xf32>
    %169 = vector.extract_strided_slice %161 {offsets = [0, 96], sizes = [2, 32], strides = [1, 1]} : vector<2x128xf32> to vector<2x32xf32>
    %170 = arith.mulf %163, %149 : vector<2x32xf32>
    %171 = arith.mulf %162, %168 : vector<2x32xf32>
    %172 = arith.addf %170, %171 : vector<2x32xf32>
    %173 = math.tanh %172 : vector<2x32xf32>
    %174 = arith.mulf %169, %173 : vector<2x32xf32>
    %175 = vector.extract_strided_slice %11 {offsets = [0, 7, 0], sizes = [2, 1, 128], strides = [1, 1, 1]} : vector<2x8x128xf32> to vector<2x1x128xf32>
    %176 = vector.shape_cast %175 : vector<2x1x128xf32> to vector<2x128xf32>
    %177 = arith.truncf %174 : vector<2x32xf32> to vector<2x32xbf16>
    %cst_41 = arith.constant dense<0.000000e+00> : vector<2x128xf32>
    %178 = tpu.matmul %177, %4, %cst_41 {dimension_numbers = #tpu.dot_dimension_numbers<[1], [0], [0], [1], [0, 0, 1, 1], [], []>} : vector<2x32xbf16>, vector<32x128xbf16>, vector<2x128xf32> -> vector<2x128xf32>
    %179 = arith.addf %176, %178 : vector<2x128xf32>
    %180 = arith.negf %179 : vector<2x128xf32>
    %181 = math.exp %180 : vector<2x128xf32>
    %cst_42 = arith.constant 1.000000e+00 : f32
    %182 = vector.broadcast %cst_42 : f32 to vector<2x128xf32>
    %183 = arith.addf %182, %181 : vector<2x128xf32>
    %184 = arith.divf %182, %183 : vector<2x128xf32>
    %185 = vector.extract_strided_slice %184 {offsets = [0, 0], sizes = [2, 32], strides = [1, 1]} : vector<2x128xf32> to vector<2x32xf32>
    %186 = vector.extract_strided_slice %184 {offsets = [0, 32], sizes = [2, 32], strides = [1, 1]} : vector<2x128xf32> to vector<2x32xf32>
    %187 = vector.extract_strided_slice %184 {offsets = [0, 64], sizes = [2, 32], strides = [1, 1]} : vector<2x128xf32> to vector<2x32xf32>
    %cst_43 = arith.constant 2.000000e+00 : f32
    %188 = vector.broadcast %cst_43 : f32 to vector<2x32xf32>
    %189 = arith.mulf %188, %187 : vector<2x32xf32>
    %cst_44 = arith.constant 1.000000e+00 : f32
    %190 = vector.broadcast %cst_44 : f32 to vector<2x32xf32>
    %191 = arith.subf %189, %190 : vector<2x32xf32>
    %192 = vector.extract_strided_slice %184 {offsets = [0, 96], sizes = [2, 32], strides = [1, 1]} : vector<2x128xf32> to vector<2x32xf32>
    %193 = arith.mulf %186, %172 : vector<2x32xf32>
    %194 = arith.mulf %185, %191 : vector<2x32xf32>
    %195 = arith.addf %193, %194 : vector<2x32xf32>
    %196 = math.tanh %195 : vector<2x32xf32>
    %197 = arith.mulf %192, %196 : vector<2x32xf32>
    %c0_45 = arith.constant 0 : index
    %c0_46 = arith.constant 0 : index
    %198 = vector.load %arg7[%c0_45, %c0_46] : memref<2x32xf32, #tpu.memory_space<vmem>>, vector<2x32xf32>
    tpu.vector_store %arg7[%c0_45, %c0_46], %197 {strides = array<i32>} : memref<2x32xf32, #tpu.memory_space<vmem>>, vector<2x32xf32>,
    %c0_47 = arith.constant 0 : index
    %c0_48 = arith.constant 0 : index
    %199 = vector.load %arg8[%c0_47, %c0_48] : memref<2x32xf32, #tpu.memory_space<vmem>>, vector<2x32xf32>
    tpu.vector_store %arg8[%c0_47, %c0_48], %195 {strides = array<i32>} : memref<2x32xf32, #tpu.memory_space<vmem>>, vector<2x32xf32>,
    %200 = tpu.concatenate %36, %59, %82, %105 in 1 : vector<2x32xf32>, vector<2x32xf32>, vector<2x32xf32>, vector<2x32xf32> -> vector<2x128xf32>
    %201 = arith.truncf %200 : vector<2x128xf32> to vector<2x128xbf16>
    %c0_49 = arith.constant 0 : index
    %c0_50 = arith.constant 0 : index
    %c0_51 = arith.constant 0 : index
    %202 = vector.load %arg6[%c0_49, %c0_50, %c0_51] : memref<2x2x128xbf16, #tpu.memory_space<vmem>>, vector<2x1x128xbf16>
    %203 = vector.shape_cast %202 : vector<2x1x128xbf16> to vector<2x128xbf16>
    %204 = vector.shape_cast %201 : vector<2x128xbf16> to vector<2x1x128xbf16>
    tpu.vector_store %arg6[%c0_49, %c0_50, %c0_51], %204 {strides = array<i32>} : memref<2x2x128xbf16, #tpu.memory_space<vmem>>, vector<2x1x128xbf16>,
    %205 = tpu.concatenate %128, %151, %174, %197 in 1 : vector<2x32xf32>, vector<2x32xf32>, vector<2x32xf32>, vector<2x32xf32> -> vector<2x128xf32>
    %206 = arith.truncf %205 : vector<2x128xf32> to vector<2x128xbf16>
    %c0_52 = arith.constant 0 : index
    %c1 = arith.constant 1 : index
    %c0_53 = arith.constant 0 : index
    %207 = vector.load %arg6[%c0_52, %c1, %c0_53] : memref<2x2x128xbf16, #tpu.memory_space<vmem>>, vector<2x1x128xbf16>
    %208 = vector.shape_cast %207 : vector<2x1x128xbf16> to vector<2x128xbf16>
    %209 = vector.shape_cast %206 : vector<2x128xbf16> to vector<2x1x128xbf16>
    tpu.vector_store %arg6[%c0_52, %c1, %c0_53], %209 {strides = array<i32>} : memref<2x2x128xbf16, #tpu.memory_space<vmem>>, vector<2x1x128xbf16>,
    return
  }
  func.func @transform_0(%arg0: i32, %arg1: i32) -> (i32, i32, i32) {
    %c0_i32 = arith.constant 0 : i32
    %c0_i32_0 = arith.constant 0 : i32
    return %arg0, %arg1, %c0_i32 : i32, i32, i32
  }
  func.func @transform_1(%arg0: i32, %arg1: i32) -> (i32, i32) {
    %c0_i32 = arith.constant 0 : i32
    %c0_i32_0 = arith.constant 0 : i32
    %c0_i32_1 = arith.constant 0 : i32
    return %c0_i32, %c0_i32_0 : i32, i32
  }
  func.func @transform_2(%arg0: i32, %arg1: i32) -> (i32, i32) {
    %c0_i32 = arith.constant 0 : i32
    %c0_i32_0 = arith.constant 0 : i32
    %c0_i32_1 = arith.constant 0 : i32
    return %c0_i32, %c0_i32_0 : i32, i32
  }
  func.func @transform_3(%arg0: i32, %arg1: i32) -> (i32, i32) {
    %c0_i32 = arith.constant 0 : i32
    %c0_i32_0 = arith.constant 0 : i32
    %c0_i32_1 = arith.constant 0 : i32
    return %c0_i32, %c0_i32_0 : i32, i32
  }
  func.func @transform_4(%arg0: i32, %arg1: i32) -> (i32, i32, i32) {
    %c0_i32 = arith.constant 0 : i32
    %c0_i32_0 = arith.constant 0 : i32
    return %arg0, %arg1, %c0_i32 : i32, i32, i32
  }
}

</mosaic_0001>

<bundles_post_ra>
// kernel: tpu_custom_call.1
= control target key start
LH: loop header
LB: loop body
LE: loop exit
PB: predicated region body
PF: predicated region fallthrough
CT: control target
= control target key end

     0   :  { %9 = vsyncpa [#allocation5], 0  ;;  %s1947_s0 = inlined_call_operand.hbm [shape: bf16[2,8,32], index: 0, kind: input, shape index: {}]   ;;  %s1948_s1 = inlined_call_operand.hbm [shape: bf16[32,128], index: 1, kind: input, shape index: {}]   ;;  %s1949_s2 = inlined_call_operand.hbm [shape: bf16[32,128], index: 2, kind: input, shape index: {}]   ;;  %s1950_s3 = inlined_call_operand.vmem [shape: f32[1,128], index: 3, kind: input, shape index: {}]   ;;  %s1951_s4 = inlined_call_operand.hbm [shape: bf16[2,2,128], index: 4, kind: output, shape index: {}]  }
   0x1   :  { %10 = vsyncpa [#allocation8], 0 }
   0x2   :  { %11 = vsyncpa [#allocation6], 0  ;;  %s1615_s15 = smov [#allocation7]   ;;  %s1616_s17 = smov [#allocation4]  }
   0x3   :  { %s29_s16 = sshll.u32 %s1615_s15, 4  ;;  %s17_s18 = sshll.u32 %s1616_s17, 4  ;;  %s30_s16 = int_to_ptr.vmem [resolvable:$true] %s29_s16  ;;  %s1653_s18 = int_to_ptr.vmem [resolvable:$true] %s17_s18 }
   0x4   :  { %s1521_s21 = scalar_lea.hbm %s1948_s1, 256 }
   0x5   :  { %p1522_p0 = scmp.ne.s32.totalorder %s1948_s1, %s1521_s21  ;;  %p1525_p1 = scmp.lt.u32.totalorder %s1521_s21, %s1948_s1 }
   0x7   :  { %p1527_p2 = pnand %p1525_p1, %p1522_p0 }
   0x9   :  { %1530 = shalt.err (!%p1527_p2)
}
   0xa   :  { %s1531_s26 = scalar_lea.vmem %s30_s16, 256  ;;  %p1536_p4 = scmp.lt.s32.totalorder %s30_s16, %s30_s16 }
   0xb   :  { %p1532_p3 = scmp.ne.s32.totalorder %s30_s16, %s1531_s26  ;;  %p1537_p5 = scmp.lt.s32.totalorder %s1531_s26, %s1531_s26 }
   0xd   :  { %p1538_p6 = por %p1537_p5, %p1536_p4 }
   0xf   :  { %p1539_p7 = pnand %p1538_p6, %p1532_p3 }
  0x11   :  { %1542 = shalt.err (!%p1539_p7)
}
  0x12   :  { %s1617_s27 = smov 64   ;;  %s1618_s28 = smov 4  }
  0x13   :  { %35 = dma.hbm_to_vmem [thread:$0]  %s1948_s1, 256, %s30_s16, [#allocation8], %s1617_s27, %s1617_s27, %s1618_s28  }
  0x14   :  { %s1543_s7 = scalar_lea.hbm %s1947_s0, 128 }
  0x15   :  { %p1544_p8 = scmp.ne.s32.totalorder %s1947_s0, %s1543_s7  ;;  %p1547_p9 = scmp.lt.u32.totalorder %s1543_s7, %s1947_s0 }
  0x17   :  { %p1549_p10 = pnand %p1547_p9, %p1544_p8 }
  0x19   :  { %1552 = shalt.err (!%p1549_p10)
}
  0x1a   :  { %s1553_s12 = scalar_lea.vmem %s1653_s18, 128  ;;  %p1558_p12 = scmp.lt.s32.totalorder %s1653_s18, %s1653_s18 }
  0x1b   :  { %p1554_p11 = scmp.ne.s32.totalorder %s1653_s18, %s1553_s12  ;;  %p1559_p13 = scmp.lt.s32.totalorder %s1553_s12, %s1553_s12 }
  0x1d   :  { %p1560_p0 = por %p1559_p13, %p1558_p12 }
  0x1f   :  { %p1561_p1 = pnand %p1560_p0, %p1554_p11 }
  0x21   :  { %1564 = shalt.err (!%p1561_p1)
}
  0x22   :  { %23 = dma.hbm_to_vmem [thread:$0]  %s1947_s0, 128, %s1653_s18, [#allocation5], %s1617_s27, %s1617_s27, %s1618_s28  }
  0x23   :  { %s1619_s14 = smov [#allocation9]   ;;  %s1565_s19 = scalar_lea.hbm %s1949_s2, 256 }
  0x24   :  { %s41_s15 = sshll.u32 %s1619_s14, 4  ;;  %p1566_p2 = scmp.ne.s32.totalorder %s1949_s2, %s1565_s19  ;;  %s42_s15 = int_to_ptr.vmem [resolvable:$true] %s41_s15 }
  0x25   :  { %p1569_p3 = scmp.lt.u32.totalorder %s1565_s19, %s1949_s2 }
  0x27   :  { %p1571_p4 = pnand %p1569_p3, %p1566_p2 }
  0x29   :  { %1574 = shalt.err (!%p1571_p4)
}
  0x2a   :  { %s1575_s24 = scalar_lea.vmem %s42_s15, 256  ;;  %p1580_p6 = scmp.lt.s32.totalorder %s42_s15, %s42_s15 }
  0x2b   :  { %p1576_p5 = scmp.ne.s32.totalorder %s42_s15, %s1575_s24  ;;  %p1581_p7 = scmp.lt.s32.totalorder %s1575_s24, %s1575_s24 }
  0x2d   :  { %p1582_p8 = por %p1581_p7, %p1580_p6 }
  0x2f   :  { %p1583_p9 = pnand %p1582_p8, %p1576_p5 }
  0x31   :  { %1586 = shalt.err (!%p1583_p9)
}
  0x32   :  { %47 = dma.hbm_to_vmem [thread:$0]  %s1949_s2, 256, %s42_s15, [#allocation8], %s1617_s27, %s1617_s27, %s1618_s28  }
  0x33   :  { %1609 = dma.done.wait [#allocation5], 128  }
  0x34   :  { %1610 = vsyncadd [#allocation5], 4294967168 }
  0x35   :  { %1611 = dma.done.wait [#allocation8], 512  }
  0x36   :  { %1612 = vsyncadd [#allocation8], 4294966784  ;;  %vm64_vm0 = vcmask 254976   ;;  %v1620_v0 = vmov 0.0   ;;  %vm1621_vm1 = vmmov 0   ;;  %v1420_v1 = vld [vmem:[#allocation7] sm:$0xff]  }
  0x37   :  { %1335 = vmatprep.subr.bf16.mxu0 %v1620_v0  ;;  %1343 = vmatprep.subr.bf16.mxu1 %v1620_v0  ;;  %65 = vst.msk [vmem:[#allocation2] sm:$0x3] %vm64_vm0, %v1620_v0  ;;  %66 = vst.msk [vmem:[#allocation3] sm:$0x3] %vm64_vm0, %v1620_v0  ;;  %v1713_v2 = vld [vmem:[#allocation9] sm:$0xff]   ;;  %v1422_v3 = vld [vmem:[#allocation7 + $0x8] sm:$0xff]  }
  0x38   :  { %1339 = vmatprep.mubr.msk.bf16.mxu0 %vm1621_vm1, %v1620_v0  ;;  %1347 = vmatprep.mubr.msk.bf16.mxu1 %vm1621_vm1, %v1620_v0  ;;  %v1717_v4 = vld [vmem:[#allocation9 + $0x8] sm:$0xff]   ;;  %vm101_vm2 = vcmask 261120   ;;  %s1622_s2 = smov 32   ;;  %v1259_v10 = vld [vmem:[%s1950_s3] ss:$0 sm:$0xff]  ;;  %vm275_vm3 = vcmask 1041409  }
  0x39   :  { %1336 = vmatpush3.bf16.msra.mxu0 %v1420_v1  ;;  %1344 = vmatpush3.bf16.msra.mxu1 %v1713_v2  ;;  %v1424_v5 = vld [vmem:[#allocation4] sm:$0xff]   ;;  %vm1183_vm4 = vcmask 1045509   ;;  %s1623_s3 = smov 96   ;;  %vm1145_vm5 = vcmask 523264   ;;  %vm1147_vm6 = vcmask 785408   ;;  %vm1171_vm7 = vcmask 1040384  }
  0x3a   :  { %1337 = vmatprep.subr.bf16.mxu0 %v1620_v0  ;;  %1345 = vmatprep.subr.bf16.mxu1 %v1620_v0  ;;  %vm1172_vm8 = vsmask.f32 256  ;;  %vm1233_vm10 = vsmask.f32 7938 }
  0x3b   :  { %vm1173_vm9 = vmand %vm1171_vm7, %vm1172_vm8 }
  0x3c   :  { %vm1234_vm11 = vmand %vm1171_vm7, %vm1233_vm10 }
  0x3d   :  { %1338 = vmatpush3.bf16.msra.mxu0 %v1422_v3  ;;  %1346 = vmatpush3.bf16.msra.mxu1 %v1717_v4 }
  0x3e   :  { %v146_v6 = vld [vmem:[#allocation2] sm:$0x3]  ;;  %v147_v7 = vld [vmem:[#allocation3] sm:$0x3]  ;;  %1351 = vmatprep.subr.bf16.mxu0 %v1620_v0  ;;  %1359 = vmatprep.subr.bf16.mxu1 %v1620_v0 }
  0x3f   :  { %v148_v8 = vpack.c.bf16 %v146_v6, %v146_v6  ;;  %v227_v9 = vrot.slane %v147_v7, 1 }
  0x40   :  { %1340 = vmatmul.mubr.msk.bf16.vlgmr.msra.gmra.mrb[0].mxu0 %vm101_vm2, %v1424_v5 }
  0x41   :  { %230 = vrot.lane.b32.xlu1 %v227_v9, %s1622_s2  ;;  %1348 = vmatmul.mubr.msk.bf16.vlgmr.msra.gmra.mrb[0].mxu1 %vm101_vm2, %v148_v8 }
  0x42   :  { %1352 = vmatpush3.bf16.msra.mxu0 %v1713_v2  ;;  %1355 = vmatprep.mubr.msk.bf16.mxu0 %vm1621_vm1, %v1620_v0 }
  0x43   :  { %1353 = vmatprep.subr.bf16.mxu0 %v1620_v0  ;;  %1360 = vmatpush3.bf16.msra.mxu1 %v1713_v2 }
  0x44   :  { %1361 = vmatprep.subr.bf16.mxu1 %v1620_v0  ;;  %1363 = vmatprep.mubr.msk.bf16.mxu1 %vm1621_vm1, %v1620_v0 }
  0x45   :  { %228 = vrot.lane.b32.xlu1 %v147_v7, %s1622_s2 }
  0x46   :  { %1354 = vmatpush3.bf16.msra.mxu0 %v1717_v4 }
  0x47   :  { %1367 = vmatprep.subr.bf16.mxu0 %v1620_v0  ;;  %1362 = vmatpush3.bf16.msra.mxu1 %v1717_v4 }
  0x48   :  { %1375 = vmatprep.subr.bf16.mxu1 %v1620_v0 }
  0xb3   :  { %v231_v40 = vpop.permute.xlu1 %230 }
  0xb7   :  { %v229_v42 = vpop.permute.xlu1 %228 }
 0x113   :  { %v139_v11 = vpop.f32.mrb[0].mxu0 }
 0x114   :  { %v1742_v12 = vadd.f32 %v1259_v10, %v139_v11  ;;  %v198_v13 = vpop.f32.mrb[0].mxu1  ;;  %v1341_v14 = vpop.f32.mrb[1].mxu0 }
 0x115   :  { %v205_v15 = vrot.slane %v198_v13, 1  ;;  %v1349_v16 = vpop.f32.mrb[1].mxu1  ;;  %v142_v17 = vpop.f32.mrb[2].mxu0 }
 0x116   :  { %v208_v18 = vadd.f32 %v198_v13, %v1742_v12  ;;  %v1745_v19 = vadd.f32 %v1259_v10, %v142_v17  ;;  %v201_v20 = vpop.f32.mrb[2].mxu1  ;;  %v1342_v21 = vpop.f32.mrb[3].mxu0 }
 0x117   :  { %v1350_v22 = vpop.f32.mrb[3].mxu1 }
 0x118   :  { %v1267_v23 = vmul.f32 -1.442695, %v208_v18  ;;  %v209_v24 = vadd.f32 %v205_v15, %v1745_v19 }
 0x11a   :  { %1425 = vpow2.f32 %v1267_v23  ;;  %v1268_v25 = vmul.f32 -1.442695, %v209_v24 }
 0x11c   :  { %1427 = vpow2.f32 %v1268_v25 }
 0x124   :  { %v1426_v26 = vpop.eup %1425 }
 0x125   :  { %v216_v27 = vadd.f32 1.0, %v1426_v26 }
 0x126   :  { %v1428_v28 = vpop.eup %1427 }
 0x127   :  { %v217_v29 = vadd.f32 1.0, %v1428_v28  ;;  %1429 = vrcp.f32 %v216_v27 }
 0x129   :  { %1431 = vrcp.f32 %v217_v29 }
 0x131   :  { %v1430_v30 = vpop.eup %1429 }
 0x132   :  { %v222_v34 = vmul.f32 2.0, %v1430_v30  ;;  %v234_v45 = vmul.f32 %v1430_v30, %v229_v42 }
 0x133   :  { %v1432_v31 = vpop.eup %1431 }
 0x134   :  { %v223_v32 = vmul.f32 2.0, %v1432_v31  ;;  %v1269_v35 = vadd.f32 -1.0, %v222_v34  ;;  %v235_v41 = vmul.f32 %v1432_v31, %v231_v40 }
 0x136   :  { %v1270_v33 = vadd.f32 -1.0, %v223_v32 }
 0x138   :  { %240 = vrot.lane.b32.xlu0 %v1270_v33, %s1617_s27 }
 0x13c   :  { %238 = vrot.lane.b32.xlu0 %v1269_v35, %s1617_s27 }
 0x1aa   :  { %v241_v36 = vpop.permute.xlu0 %240 }
 0x1ab   :  { %v245_v37 = vmul.f32 %v1432_v31, %v241_v36 }
 0x1ad   :  { %250 = vrot.lane.b32.xlu0 %v245_v37, %s1622_s2 }
 0x1ae   :  { %v239_v38 = vpop.permute.xlu0 %238 }
 0x1af   :  { %v244_v39 = vmul.f32 %v1430_v30, %v239_v38 }
 0x1b1   :  { %248 = vrot.lane.b32.xlu1 %v244_v39, %s1622_s2 }
 0x21f   :  { %v251_v43 = vpop.permute.xlu0 %250 }
 0x220   :  { %v1752_v44 = vadd.f32 %v251_v43, %v235_v41 }
 0x222   :  { %1433 = vtanh.f32 %v1752_v44  ;;  %v348_v28 = vrot.slane %v1752_v44, 7 }
 0x223   :  { %v249_v46 = vpop.permute.xlu1 %248 }
 0x224   :  { %v1755_v47 = vadd.f32 %v249_v46, %v234_v45 }
 0x226   :  { %1435 = vtanh.f32 %v1755_v47  ;;  %v347_v29 = vrot.slane %v1755_v47, 7 }
 0x22c   :  { %v1434_v48 = vpop.eup %1433 }
 0x22d   :  { %262 = vrot.lane.b32.xlu0 %v1434_v48, %s1617_s27 }
 0x230   :  { %v1436_v49 = vpop.eup %1435 }
 0x231   :  { %260 = vrot.lane.b32.xlu1 %v1436_v49, %s1617_s27 }
 0x29f   :  { %v263_v50 = vpop.permute.xlu0 %262 }
 0x2a0   :  { %v267_v51 = vmul.f32 %v1432_v31, %v263_v50 }
 0x2a2   :  { %v269_v52 = vpack.c.bf16 %v267_v51, %v267_v51  ;;  %v1118_v55 = vrot.slane %v267_v51, 7 }
 0x2a3   :  { %v261_v53 = vpop.permute.xlu1 %260 }
 0x2a4   :  { %v273_v54 = vunpack.c.l.b16 %v269_v52  ;;  %v266_v56 = vmul.f32 %v1430_v30, %v261_v53 }
 0x2a6   :  { %v268_v57 = vpack.c.bf16 %v266_v56, %v266_v56  ;;  %v1761_v58 = vsel %vm275_vm3, %v1118_v55, %v266_v56  ;;  %v274_v59 = vrot.slane %v273_v54, 7 }
 0x2a8   :  { %v272_v60 = vunpack.c.l.b16 %v268_v57 }
 0x2aa   :  { %v276_v61 = vsel %vm275_vm3, %v274_v59, %v272_v60 }
 0x2ab   :  { %v277_v62 = vpack.c.b16 %v276_v61, %v276_v61 }
 0x2ad   :  { %278 = vrot.lane.b32.xlu0 %v277_v62, %s1622_s2 }
 0x31f   :  { %v279_v63 = vpop.permute.xlu0 %278 }
 0x320   :  { %1356 = vmatmul.mubr.msk.bf16.vlgmr.msra.gmra.mrb[4].mxu0 %vm101_vm2, %v279_v63 }
 0x321   :  { %1368 = vmatpush3.bf16.msra.mxu0 %v1713_v2  ;;  %1371 = vmatprep.mubr.msk.bf16.mxu0 %vm1621_vm1, %v1620_v0 }
 0x322   :  { %1369 = vmatprep.subr.bf16.mxu0 %v1620_v0 }
 0x325   :  { %1370 = vmatpush3.bf16.msra.mxu0 %v1717_v4 }
 0x326   :  { %1383 = vmatprep.subr.bf16.mxu0 %v1620_v0 }
 0x3f3   :  { %v317_v1 = vpop.f32.mrb[4].mxu0 }
 0x3f4   :  { %v324_v3 = vrot.slane %v317_v1, 7  ;;  %v328_v5 = vadd.f32 %v317_v1, %v1745_v19  ;;  %v1357_v6 = vpop.f32.mrb[5].mxu0 }
 0x3f5   :  { %v320_v7 = vpop.f32.mrb[6].mxu0 }
 0x3f6   :  { %v327_v8 = vadd.f32 %v324_v3, %v1742_v12  ;;  %v1273_v9 = vmul.f32 -1.442695, %v328_v5  ;;  %v1358_v10 = vpop.f32.mrb[7].mxu0 }
 0x3f8   :  { %v1272_v11 = vmul.f32 -1.442695, %v327_v8  ;;  %1437 = vpow2.f32 %v1273_v9 }
 0x3fa   :  { %1439 = vpow2.f32 %v1272_v11 }
 0x402   :  { %v1438_v13 = vpop.eup %1437 }
 0x403   :  { %v336_v14 = vadd.f32 1.0, %v1438_v13 }
 0x404   :  { %v1440_v15 = vpop.eup %1439 }
 0x405   :  { %v335_v16 = vadd.f32 1.0, %v1440_v15  ;;  %1441 = vrcp.f32 %v336_v14 }
 0x407   :  { %1443 = vrcp.f32 %v335_v16 }
 0x40f   :  { %v1442_v17 = vpop.eup %1441 }
 0x410   :  { %v342_v18 = vmul.f32 2.0, %v1442_v17  ;;  %v352_v30 = vmul.f32 %v1442_v17, %v348_v28 }
 0x411   :  { %v1444_v20 = vpop.eup %1443 }
 0x412   :  { %v1275_v21 = vadd.f32 -1.0, %v342_v18  ;;  %v341_v22 = vmul.f32 2.0, %v1444_v20  ;;  %v351_v33 = vmul.f32 %v1444_v20, %v347_v29 }
 0x414   :  { %357 = vrot.lane.b32.xlu0 %v1275_v21, %s1617_s27  ;;  %v1274_v23 = vadd.f32 -1.0, %v341_v22 }
 0x416   :  { %355 = vrot.lane.b32.xlu1 %v1274_v23, %s1617_s27 }
 0x486   :  { %v358_v24 = vpop.permute.xlu0 %357 }
 0x487   :  { %v362_v25 = vmul.f32 %v1442_v17, %v358_v24 }
 0x488   :  { %v356_v26 = vpop.permute.xlu1 %355 }
 0x489   :  { %v361_v27 = vmul.f32 %v1444_v20, %v356_v26  ;;  %367 = vrot.lane.b32.xlu0 %v362_v25, %s1622_s2 }
 0x48b   :  { %365 = vrot.lane.b32.xlu1 %v361_v27, %s1622_s2 }
 0x4fb   :  { %v368_v31 = vpop.permute.xlu0 %367 }
 0x4fc   :  { %v1780_v32 = vadd.f32 %v368_v31, %v352_v30 }
 0x4fd   :  { %v366_v34 = vpop.permute.xlu1 %365 }
 0x4fe   :  { %1445 = vtanh.f32 %v1780_v32  ;;  %v371_v35 = vadd.f32 %v366_v34, %v351_v33  ;;  %v465_v18 = vrot.slane %v1780_v32, 7 }
 0x500   :  { %1447 = vtanh.f32 %v371_v35 }
 0x508   :  { %v1446_v36 = vpop.eup %1445 }
 0x509   :  { %379 = vrot.lane.b32.xlu0 %v1446_v36, %s1617_s27 }
 0x50a   :  { %v1448_v37 = vpop.eup %1447 }
 0x50b   :  { %377 = vrot.lane.b32.xlu1 %v1448_v37, %s1617_s27 }
 0x57b   :  { %v380_v38 = vpop.permute.xlu0 %379 }
 0x57c   :  { %v384_v39 = vmul.f32 %v1442_v17, %v380_v38  ;;  %v464_v17 = vrot.slane %v371_v35, 7 }
 0x57d   :  { %v378_v40 = vpop.permute.xlu1 %377 }
 0x57e   :  { %v383_v41 = vmul.f32 %v1444_v20, %v378_v40  ;;  %v386_v42 = vpack.c.bf16 %v384_v39, %v384_v39 }
 0x580   :  { %v385_v43 = vpack.c.bf16 %v383_v41, %v383_v41  ;;  %v1125_v44 = vrot.slane %v383_v41, 1  ;;  %v390_v47 = vunpack.c.l.b16 %v386_v42 }
 0x582   :  { %v389_v45 = vunpack.c.l.b16 %v385_v43  ;;  %v1786_v46 = vsel %vm275_vm3, %v384_v39, %v1125_v44 }
 0x584   :  { %v391_v48 = vrot.slane %v389_v45, 1 }
 0x586   :  { %v392_v49 = vsel %vm275_vm3, %v390_v47, %v391_v48 }
 0x587   :  { %v393_v50 = vpack.c.b16 %v392_v49, %v392_v49 }
 0x589   :  { %394 = vrot.lane.b32.xlu1 %v393_v50, %s1622_s2 }
 0x5fb   :  { %v395_v51 = vpop.permute.xlu1 %394 }
 0x5fc   :  { %1364 = vmatmul.mubr.msk.bf16.vlgmr.msra.gmra.mrb[4].mxu1 %vm101_vm2, %v395_v51 }
 0x5fd   :  { %1376 = vmatpush3.bf16.msra.mxu1 %v1713_v2  ;;  %1379 = vmatprep.mubr.msk.bf16.mxu1 %vm1621_vm1, %v1620_v0 }
 0x5fe   :  { %1377 = vmatprep.subr.bf16.mxu1 %v1620_v0 }
 0x601   :  { %1378 = vmatpush3.bf16.msra.mxu1 %v1717_v4 }
 0x602   :  { %1391 = vmatprep.subr.bf16.mxu1 %v1620_v0 }
 0x6cf   :  { %v433_v52 = vpop.f32.mrb[4].mxu1 }
 0x6d0   :  { %v440_v53 = vrot.slane %v433_v52, 6  ;;  %v441_v54 = vrot.slane %v433_v52, 7  ;;  %v1365_v55 = vpop.f32.mrb[5].mxu1 }
 0x6d1   :  { %v436_v56 = vpop.f32.mrb[6].mxu1 }
 0x6d2   :  { %v444_v57 = vadd.f32 %v440_v53, %v1742_v12  ;;  %v445_v59 = vadd.f32 %v441_v54, %v1745_v19  ;;  %v1366_v60 = vpop.f32.mrb[7].mxu1 }
 0x6d4   :  { %v1277_v61 = vmul.f32 -1.442695, %v444_v57  ;;  %v1278_v62 = vmul.f32 -1.442695, %v445_v59 }
 0x6d6   :  { %1449 = vpow2.f32 %v1277_v61 }
 0x6d7   :  { %1451 = vpow2.f32 %v1278_v62 }
 0x6e0   :  { %v1450_v63 = vpop.eup %1449 }
 0x6e1   :  { %v1452_v1 = vpop.eup %1451  ;;  %v452_v3 = vadd.f32 1.0, %v1450_v63 }
 0x6e2   :  { %v453_v5 = vadd.f32 1.0, %v1452_v1 }
 0x6e3   :  { %1453 = vrcp.f32 %v452_v3 }
 0x6e4   :  { %1455 = vrcp.f32 %v453_v5 }
 0x6ed   :  { %v1454_v6 = vpop.eup %1453 }
 0x6ee   :  { %v1456_v7 = vpop.eup %1455  ;;  %v458_v8 = vmul.f32 2.0, %v1454_v6  ;;  %v468_v20 = vmul.f32 %v1454_v6, %v464_v17 }
 0x6ef   :  { %v459_v9 = vmul.f32 2.0, %v1456_v7  ;;  %v469_v21 = vmul.f32 %v1456_v7, %v465_v18 }
 0x6f0   :  { %v1279_v10 = vadd.f32 -1.0, %v458_v8 }
 0x6f1   :  { %v1280_v11 = vadd.f32 -1.0, %v459_v9 }
 0x6f2   :  { %472 = vrot.lane.b32.xlu0 %v1279_v10, %s1617_s27 }
 0x6f3   :  { %474 = vrot.lane.b32.xlu1 %v1280_v11, %s1617_s27 }
 0x764   :  { %v473_v13 = vpop.permute.xlu0 %472 }
 0x765   :  { %v475_v14 = vpop.permute.xlu1 %474  ;;  %v478_v15 = vmul.f32 %v1454_v6, %v473_v13 }
 0x766   :  { %v479_v16 = vmul.f32 %v1456_v7, %v475_v14 }
 0x767   :  { %482 = vrot.lane.b32.xlu0 %v478_v15, %s1622_s2 }
 0x768   :  { %484 = vrot.lane.b32.xlu1 %v479_v16, %s1622_s2 }
 0x7d9   :  { %v483_v22 = vpop.permute.xlu0 %482 }
 0x7da   :  { %v485_v23 = vpop.permute.xlu1 %484  ;;  %v1804_v24 = vadd.f32 %v483_v22, %v468_v20 }
 0x7db   :  { %v1806_v25 = vadd.f32 %v485_v23, %v469_v21 }
 0x7dc   :  { %1457 = vtanh.f32 %v1804_v24  ;;  %v582_v9 = vrot.slane %v1804_v24, 7 }
 0x7dd   :  { %1459 = vtanh.f32 %v1806_v25  ;;  %v583_v10 = vrot.slane %v1806_v25, 7 }
 0x7e6   :  { %v1458_v26 = vpop.eup %1457 }
 0x7e7   :  { %v1460_v27 = vpop.eup %1459  ;;  %494 = vrot.lane.b32.xlu0 %v1458_v26, %s1617_s27 }
 0x7e8   :  { %496 = vrot.lane.b32.xlu1 %v1460_v27, %s1617_s27 }
 0x859   :  { %v495_v28 = vpop.permute.xlu0 %494 }
 0x85a   :  { %v497_v29 = vpop.permute.xlu1 %496  ;;  %v500_v30 = vmul.f32 %v1454_v6, %v495_v28 }
 0x85b   :  { %v501_v31 = vmul.f32 %v1456_v7, %v497_v29 }
 0x85c   :  { %v502_v32 = vpack.c.bf16 %v500_v30, %v500_v30  ;;  %v1132_v33 = vrot.slane %v500_v30, 2 }
 0x85d   :  { %v503_v34 = vpack.c.bf16 %v501_v31, %v501_v31  ;;  %v1133_v35 = vrot.slane %v501_v31, 1 }
 0x85e   :  { %v506_v36 = vunpack.c.l.b16 %v502_v32 }
 0x85f   :  { %v507_v37 = vunpack.c.l.b16 %v503_v34  ;;  %v1813_v38 = vsel %vm275_vm3, %v1133_v35, %v1132_v33 }
 0x860   :  { %v508_v39 = vrot.slane %v506_v36, 2 }
 0x861   :  { %v509_v40 = vrot.slane %v507_v37, 1 }
 0x863   :  { %v510_v41 = vsel %vm275_vm3, %v509_v40, %v508_v39 }
 0x864   :  { %v511_v42 = vpack.c.b16 %v510_v41, %v510_v41 }
 0x866   :  { %512 = vrot.lane.b32.xlu0 %v511_v42, %s1622_s2 }
 0x8d8   :  { %v513_v43 = vpop.permute.xlu0 %512 }
 0x8d9   :  { %1372 = vmatmul.mubr.msk.bf16.vlgmr.msra.gmra.mrb[8].mxu0 %vm101_vm2, %v513_v43 }
 0x8da   :  { %1384 = vmatpush3.bf16.msra.mxu0 %v1713_v2  ;;  %1387 = vmatprep.mubr.msk.bf16.mxu0 %vm1621_vm1, %v1620_v0 }
 0x8db   :  { %1385 = vmatprep.subr.bf16.mxu0 %v1620_v0 }
 0x8de   :  { %1386 = vmatpush3.bf16.msra.mxu0 %v1717_v4 }
 0x8df   :  { %1399 = vmatprep.subr.bf16.mxu0 %v1620_v0 }
 0x9ac   :  { %v551_v44 = vpop.f32.mrb[8].mxu0 }
 0x9ad   :  { %v558_v45 = vrot.slane %v551_v44, 5  ;;  %v559_v47 = vrot.slane %v551_v44, 6  ;;  %v1373_v48 = vpop.f32.mrb[9].mxu0 }
 0x9ae   :  { %v554_v49 = vpop.f32.mrb[10].mxu0 }
 0x9af   :  { %v562_v50 = vadd.f32 %v558_v45, %v1742_v12  ;;  %v563_v51 = vadd.f32 %v559_v47, %v1745_v19  ;;  %v1374_v52 = vpop.f32.mrb[11].mxu0 }
 0x9b1   :  { %v1282_v53 = vmul.f32 -1.442695, %v562_v50  ;;  %v1283_v54 = vmul.f32 -1.442695, %v563_v51 }
 0x9b3   :  { %1461 = vpow2.f32 %v1282_v53 }
 0x9b4   :  { %1463 = vpow2.f32 %v1283_v54 }
 0x9bd   :  { %v1462_v55 = vpop.eup %1461 }
 0x9be   :  { %v1464_v56 = vpop.eup %1463  ;;  %v570_v57 = vadd.f32 1.0, %v1462_v55 }
 0x9bf   :  { %v571_v59 = vadd.f32 1.0, %v1464_v56 }
 0x9c0   :  { %1465 = vrcp.f32 %v570_v57 }
 0x9c1   :  { %1467 = vrcp.f32 %v571_v59 }
 0x9ca   :  { %v1466_v60 = vpop.eup %1465 }
 0x9cb   :  { %v1468_v61 = vpop.eup %1467  ;;  %v576_v62 = vmul.f32 2.0, %v1466_v60  ;;  %v586_v11 = vmul.f32 %v1466_v60, %v582_v9 }
 0x9cc   :  { %v577_v63 = vmul.f32 2.0, %v1468_v61  ;;  %v587_v13 = vmul.f32 %v1468_v61, %v583_v10 }
 0x9cd   :  { %v1284_v1 = vadd.f32 -1.0, %v576_v62 }
 0x9ce   :  { %v1285_v3 = vadd.f32 -1.0, %v577_v63 }
 0x9cf   :  { %590 = vrot.lane.b32.xlu1 %v1284_v1, %s1617_s27 }
 0x9d0   :  { %592 = vrot.lane.b32.xlu0 %v1285_v3, %s1617_s27 }
 0xa41   :  { %v591_v5 = vpop.permute.xlu1 %590 }
 0xa42   :  { %v593_v6 = vpop.permute.xlu0 %592  ;;  %v596_v7 = vmul.f32 %v1466_v60, %v591_v5 }
 0xa43   :  { %v597_v8 = vmul.f32 %v1468_v61, %v593_v6 }
 0xa44   :  { %600 = vrot.lane.b32.xlu1 %v596_v7, %s1622_s2 }
 0xa45   :  { %602 = vrot.lane.b32.xlu0 %v597_v8, %s1622_s2 }
 0xab6   :  { %v601_v14 = vpop.permute.xlu1 %600 }
 0xab7   :  { %v603_v15 = vpop.permute.xlu0 %602  ;;  %v1832_v16 = vadd.f32 %v601_v14, %v586_v11 }
 0xab8   :  { %v1834_v17 = vadd.f32 %v603_v15, %v587_v13 }
 0xab9   :  { %1469 = vtanh.f32 %v1832_v16  ;;  %v700_v1 = vrot.slane %v1832_v16, 7 }
 0xaba   :  { %1471 = vtanh.f32 %v1834_v17  ;;  %v701_v3 = vrot.slane %v1834_v17, 7 }
 0xac3   :  { %v1470_v18 = vpop.eup %1469 }
 0xac4   :  { %v1472_v20 = vpop.eup %1471  ;;  %612 = vrot.lane.b32.xlu1 %v1470_v18, %s1617_s27 }
 0xac5   :  { %614 = vrot.lane.b32.xlu0 %v1472_v20, %s1617_s27 }
 0xb36   :  { %v613_v21 = vpop.permute.xlu1 %612 }
 0xb37   :  { %v615_v22 = vpop.permute.xlu0 %614  ;;  %v618_v23 = vmul.f32 %v1466_v60, %v613_v21 }
 0xb38   :  { %v619_v24 = vmul.f32 %v1468_v61, %v615_v22 }
 0xb39   :  { %v620_v25 = vpack.c.bf16 %v618_v23, %v618_v23  ;;  %v1140_v26 = vrot.slane %v618_v23, 3 }
 0xb3a   :  { %v621_v27 = vpack.c.bf16 %v619_v24, %v619_v24  ;;  %v1141_v28 = vrot.slane %v619_v24, 2 }
 0xb3b   :  { %v624_v29 = vunpack.c.l.b16 %v620_v25 }
 0xb3c   :  { %v625_v30 = vunpack.c.l.b16 %v621_v27  ;;  %v1841_v31 = vsel %vm275_vm3, %v1141_v28, %v1140_v26 }
 0xb3d   :  { %v626_v32 = vrot.slane %v624_v29, 3 }
 0xb3e   :  { %v627_v33 = vrot.slane %v625_v30, 2 }
 0xb40   :  { %v628_v34 = vsel %vm275_vm3, %v627_v33, %v626_v32 }
 0xb41   :  { %v629_v35 = vpack.c.b16 %v628_v34, %v628_v34 }
 0xb43   :  { %630 = vrot.lane.b32.xlu1 %v629_v35, %s1622_s2 }
 0xbb5   :  { %v631_v36 = vpop.permute.xlu1 %630 }
 0xbb6   :  { %1380 = vmatmul.mubr.msk.bf16.vlgmr.msra.gmra.mrb[8].mxu1 %vm101_vm2, %v631_v36 }
 0xbb7   :  { %1392 = vmatpush3.bf16.msra.mxu1 %v1713_v2  ;;  %1395 = vmatprep.mubr.msk.bf16.mxu1 %vm1621_vm1, %v1620_v0 }
 0xbb8   :  { %1393 = vmatprep.subr.bf16.mxu1 %v1620_v0 }
 0xbbb   :  { %1394 = vmatpush3.bf16.msra.mxu1 %v1717_v4 }
 0xc89   :  { %v669_v37 = vpop.f32.mrb[8].mxu1 }
 0xc8a   :  { %v676_v39 = vrot.slane %v669_v37, 4  ;;  %v677_v40 = vrot.slane %v669_v37, 5  ;;  %v1381_v41 = vpop.f32.mrb[9].mxu1 }
 0xc8b   :  { %v672_v42 = vpop.f32.mrb[10].mxu1 }
 0xc8c   :  { %v680_v43 = vadd.f32 %v676_v39, %v1742_v12  ;;  %v681_v44 = vadd.f32 %v677_v40, %v1745_v19  ;;  %v1382_v45 = vpop.f32.mrb[11].mxu1 }
 0xc8e   :  { %v1287_v47 = vmul.f32 -1.442695, %v680_v43  ;;  %v1288_v48 = vmul.f32 -1.442695, %v681_v44 }
 0xc90   :  { %1473 = vpow2.f32 %v1287_v47 }
 0xc91   :  { %1475 = vpow2.f32 %v1288_v48 }
 0xc9a   :  { %v1474_v49 = vpop.eup %1473 }
 0xc9b   :  { %v1476_v50 = vpop.eup %1475  ;;  %v688_v51 = vadd.f32 1.0, %v1474_v49 }
 0xc9c   :  { %v689_v52 = vadd.f32 1.0, %v1476_v50 }
 0xc9d   :  { %1477 = vrcp.f32 %v688_v51 }
 0xc9e   :  { %1479 = vrcp.f32 %v689_v52 }
 0xca7   :  { %v1478_v53 = vpop.eup %1477 }
 0xca8   :  { %v1480_v54 = vpop.eup %1479  ;;  %v694_v55 = vmul.f32 2.0, %v1478_v53  ;;  %v704_v5 = vmul.f32 %v1478_v53, %v700_v1 }
 0xca9   :  { %v695_v56 = vmul.f32 2.0, %v1480_v54  ;;  %v705_v6 = vmul.f32 %v1480_v54, %v701_v3 }
 0xcaa   :  { %v1289_v57 = vadd.f32 -1.0, %v694_v55 }
 0xcab   :  { %v1290_v59 = vadd.f32 -1.0, %v695_v56 }
 0xcac   :  { %708 = vrot.lane.b32.xlu0 %v1289_v57, %s1617_s27 }
 0xcad   :  { %710 = vrot.lane.b32.xlu1 %v1290_v59, %s1617_s27 }
 0xd1e   :  { %v709_v60 = vpop.permute.xlu0 %708 }
 0xd1f   :  { %v711_v61 = vpop.permute.xlu1 %710  ;;  %v714_v62 = vmul.f32 %v1478_v53, %v709_v60 }
 0xd20   :  { %v715_v63 = vmul.f32 %v1480_v54, %v711_v61 }
 0xd21   :  { %718 = vrot.lane.b32.xlu0 %v714_v62, %s1622_s2 }
 0xd22   :  { %720 = vrot.lane.b32.xlu1 %v715_v63, %s1622_s2 }
 0xd93   :  { %v719_v7 = vpop.permute.xlu0 %718 }
 0xd94   :  { %v721_v8 = vpop.permute.xlu1 %720  ;;  %v1859_v9 = vadd.f32 %v719_v7, %v704_v5 }
 0xd95   :  { %v1861_v10 = vadd.f32 %v721_v8, %v705_v6 }
 0xd96   :  { %1481 = vtanh.f32 %v1859_v9 }
 0xd97   :  { %1483 = vtanh.f32 %v1861_v10  ;;  %v819_v55 = vrot.slane %v1861_v10, 7 }
 0xda0   :  { %v1482_v11 = vpop.eup %1481 }
 0xda1   :  { %v1484_v13 = vpop.eup %1483  ;;  %730 = vrot.lane.b32.xlu0 %v1482_v11, %s1617_s27 }
 0xda2   :  { %732 = vrot.lane.b32.xlu1 %v1484_v13, %s1617_s27 }
 0xe13   :  { %v731_v14 = vpop.permute.xlu0 %730 }
 0xe14   :  { %v733_v15 = vpop.permute.xlu1 %732  ;;  %v736_v16 = vmul.f32 %v1478_v53, %v731_v14 }
 0xe15   :  { %v737_v17 = vmul.f32 %v1480_v54, %v733_v15  ;;  %v818_v54 = vrot.slane %v1859_v9, 7 }
 0xe16   :  { %v738_v18 = vpack.c.bf16 %v736_v16, %v736_v16 }
 0xe17   :  { %v739_v20 = vpack.c.bf16 %v737_v17, %v737_v17  ;;  %v1182_v21 = vrot.slane %v737_v17, 7 }
 0xe18   :  { %v742_v22 = vunpack.c.l.b16 %v738_v18 }
 0xe19   :  { %v743_v23 = vunpack.c.l.b16 %v739_v20  ;;  %v1868_v24 = vsel %vm1183_vm4, %v1182_v21, %v736_v16 }
 0xe1a   :  { %v744_v25 = vrot.slane %v742_v22, 4 }
 0xe1b   :  { %v745_v26 = vrot.slane %v743_v23, 3 }
 0xe1d   :  { %v746_v27 = vsel %vm275_vm3, %v745_v26, %v744_v25 }
 0xe1e   :  { %v747_v28 = vpack.c.b16 %v746_v27, %v746_v27 }
 0xe20   :  { %748 = vrot.lane.b32.xlu0 %v747_v28, %s1622_s2 }
 0xe92   :  { %v749_v29 = vpop.permute.xlu0 %748 }
 0xe93   :  { %1388 = vmatmul.mubr.msk.bf16.vlgmr.msra.gmra.mrb[12].mxu0 %vm101_vm2, %v749_v29 }
 0xe94   :  { %1400 = vmatpush3.bf16.msra.mxu0 %v1713_v2  ;;  %1403 = vmatprep.mubr.msk.bf16.mxu0 %vm1621_vm1, %v1620_v0 }
 0xe95   :  { %1401 = vmatprep.subr.bf16.mxu0 %v1620_v0 }
 0xe98   :  { %1402 = vmatpush3.bf16.msra.mxu0 %v1717_v4 }
 0xf66   :  { %v787_v30 = vpop.f32.mrb[12].mxu0 }
 0xf67   :  { %v794_v32 = vrot.slane %v787_v30, 3  ;;  %v795_v33 = vrot.slane %v787_v30, 4  ;;  %v1389_v34 = vpop.f32.mrb[13].mxu0 }
 0xf68   :  { %v790_v35 = vpop.f32.mrb[14].mxu0 }
 0xf69   :  { %v798_v36 = vadd.f32 %v794_v32, %v1742_v12  ;;  %v799_v37 = vadd.f32 %v795_v33, %v1745_v19  ;;  %v1390_v39 = vpop.f32.mrb[15].mxu0 }
 0xf6b   :  { %v1292_v40 = vmul.f32 -1.442695, %v798_v36  ;;  %v1293_v41 = vmul.f32 -1.442695, %v799_v37 }
 0xf6d   :  { %1485 = vpow2.f32 %v1292_v40 }
 0xf6e   :  { %1487 = vpow2.f32 %v1293_v41 }
 0xf77   :  { %v1486_v2 = vpop.eup %1485 }
 0xf78   :  { %v1488_v42 = vpop.eup %1487  ;;  %v806_v43 = vadd.f32 1.0, %v1486_v2 }
 0xf79   :  { %v807_v0 = vadd.f32 1.0, %v1488_v42 }
 0xf7a   :  { %1489 = vrcp.f32 %v806_v43 }
 0xf7b   :  { %1491 = vrcp.f32 %v807_v0 }
 0xf84   :  { %v1490_v4 = vpop.eup %1489 }
 0xf85   :  { %v1492_v44 = vpop.eup %1491  ;;  %v812_v45 = vmul.f32 2.0, %v1490_v4  ;;  %v822_v56 = vmul.f32 %v1490_v4, %v818_v54 }
 0xf86   :  { %v813_v47 = vmul.f32 2.0, %v1492_v44  ;;  %v823_v57 = vmul.f32 %v1492_v44, %v819_v55 }
 0xf87   :  { %v1294_v48 = vadd.f32 -1.0, %v812_v45 }
 0xf88   :  { %v1295_v49 = vadd.f32 -1.0, %v813_v47 }
 0xf89   :  { %826 = vrot.lane.b32.xlu1 %v1294_v48, %s1617_s27 }
 0xf8a   :  { %828 = vrot.lane.b32.xlu0 %v1295_v49, %s1617_s27 }
 0xffb   :  { %v827_v50 = vpop.permute.xlu1 %826 }
 0xffc   :  { %v829_v51 = vpop.permute.xlu0 %828  ;;  %v832_v52 = vmul.f32 %v1490_v4, %v827_v50 }
 0xffd   :  { %v833_v53 = vmul.f32 %v1492_v44, %v829_v51 }
 0xffe   :  { %836 = vrot.lane.b32.xlu1 %v832_v52, %s1622_s2 }
 0xfff   :  { %838 = vrot.lane.b32.xlu0 %v833_v53, %s1622_s2 }
0x1070   :  { %v837_v59 = vpop.permute.xlu1 %836 }
0x1071   :  { %v839_v60 = vpop.permute.xlu0 %838  ;;  %v842_v61 = vadd.f32 %v837_v59, %v822_v56 }
0x1072   :  { %v843_v62 = vadd.f32 %v839_v60, %v823_v57 }
0x1073   :  { %1493 = vtanh.f32 %v842_v61  ;;  %v936_v45 = vrot.slane %v842_v61, 7 }
0x1074   :  { %1495 = vtanh.f32 %v843_v62  ;;  %v937_v47 = vrot.slane %v843_v62, 7 }
0x107d   :  { %v1494_v63 = vpop.eup %1493 }
0x107e   :  { %v1496_v1 = vpop.eup %1495  ;;  %848 = vrot.lane.b32.xlu1 %v1494_v63, %s1617_s27 }
0x107f   :  { %850 = vrot.lane.b32.xlu0 %v1496_v1, %s1617_s27 }
0x10f0   :  { %v849_v3 = vpop.permute.xlu1 %848 }
0x10f1   :  { %v851_v5 = vpop.permute.xlu0 %850  ;;  %v854_v6 = vmul.f32 %v1490_v4, %v849_v3 }
0x10f2   :  { %v855_v7 = vmul.f32 %v1492_v44, %v851_v5 }
0x10f3   :  { %v856_v8 = vpack.c.bf16 %v854_v6, %v854_v6  ;;  %v1190_v9 = vrot.slane %v854_v6, 1 }
0x10f4   :  { %v857_v10 = vpack.c.bf16 %v855_v7, %v855_v7 }
0x10f5   :  { %v860_v11 = vunpack.c.l.b16 %v856_v8  ;;  %v1889_v13 = vsel %vm1183_vm4, %v855_v7, %v1190_v9 }
0x10f6   :  { %v861_v14 = vunpack.c.l.b16 %v857_v10 }
0x10f7   :  { %v862_v15 = vrot.slane %v860_v11, 5 }
0x10f8   :  { %v863_v16 = vrot.slane %v861_v14, 4 }
0x10fa   :  { %v864_v17 = vsel %vm275_vm3, %v863_v16, %v862_v15 }
0x10fb   :  { %v865_v18 = vpack.c.b16 %v864_v17, %v864_v17 }
0x10fd   :  { %866 = vrot.lane.b32.xlu1 %v865_v18, %s1622_s2 }
0x116f   :  { %v867_v20 = vpop.permute.xlu1 %866 }
0x1170   :  { %1396 = vmatmul.mubr.msk.bf16.vlgmr.msra.gmra.mrb[12].mxu1 %vm101_vm2, %v867_v20 }
0x1243   :  { %v905_v21 = vpop.f32.mrb[12].mxu1 }
0x1244   :  { %v912_v22 = vrot.slane %v905_v21, 2  ;;  %v913_v23 = vrot.slane %v905_v21, 3  ;;  %v1397_v25 = vpop.f32.mrb[13].mxu1 }
0x1245   :  { %v908_v26 = vpop.f32.mrb[14].mxu1 }
0x1246   :  { %v916_v27 = vadd.f32 %v912_v22, %v1742_v12  ;;  %v917_v28 = vadd.f32 %v913_v23, %v1745_v19  ;;  %v1398_v29 = vpop.f32.mrb[15].mxu1 }
0x1248   :  { %v1297_v30 = vmul.f32 -1.442695, %v916_v27  ;;  %v1298_v32 = vmul.f32 -1.442695, %v917_v28 }
0x124a   :  { %1497 = vpow2.f32 %v1297_v30 }
0x124b   :  { %1499 = vpow2.f32 %v1298_v32 }
0x1254   :  { %v1498_v33 = vpop.eup %1497 }
0x1255   :  { %v1500_v34 = vpop.eup %1499  ;;  %v924_v35 = vadd.f32 1.0, %v1498_v33 }
0x1256   :  { %v925_v36 = vadd.f32 1.0, %v1500_v34 }
0x1257   :  { %1501 = vrcp.f32 %v924_v35 }
0x1258   :  { %1503 = vrcp.f32 %v925_v36 }
0x1261   :  { %v1502_v37 = vpop.eup %1501 }
0x1262   :  { %v1504_v39 = vpop.eup %1503  ;;  %v930_v40 = vmul.f32 2.0, %v1502_v37  ;;  %v940_v48 = vmul.f32 %v1502_v37, %v936_v45 }
0x1263   :  { %v931_v41 = vmul.f32 2.0, %v1504_v39  ;;  %v941_v49 = vmul.f32 %v1504_v39, %v937_v47 }
0x1264   :  { %v1299_v2 = vadd.f32 -1.0, %v930_v40 }
0x1265   :  { %v1300_v42 = vadd.f32 -1.0, %v931_v41 }
0x1266   :  { %944 = vrot.lane.b32.xlu0 %v1299_v2, %s1617_s27 }
0x1267   :  { %946 = vrot.lane.b32.xlu1 %v1300_v42, %s1617_s27 }
0x12d8   :  { %v945_v43 = vpop.permute.xlu0 %944 }
0x12d9   :  { %v947_v0 = vpop.permute.xlu1 %946  ;;  %v950_v4 = vmul.f32 %v1502_v37, %v945_v43 }
0x12da   :  { %v951_v44 = vmul.f32 %v1504_v39, %v947_v0 }
0x12db   :  { %954 = vrot.lane.b32.xlu0 %v950_v4, %s1622_s2 }
0x12dc   :  { %956 = vrot.lane.b32.xlu1 %v951_v44, %s1622_s2 }
0x134d   :  { %v955_v50 = vpop.permute.xlu0 %954 }
0x134e   :  { %v957_v51 = vpop.permute.xlu1 %956  ;;  %v960_v52 = vadd.f32 %v955_v50, %v940_v48 }
0x134f   :  { %v961_v53 = vadd.f32 %v957_v51, %v941_v49 }
0x1350   :  { %1505 = vtanh.f32 %v960_v52  ;;  %v1054_v40 = vrot.slane %v960_v52, 7  ;;  %v1624_v52 = vmov 1966171168  }
0x1351   :  { %1507 = vtanh.f32 %v961_v53  ;;  %v1055_v41 = vrot.slane %v961_v53, 7  ;;  %v1152_v53 = vunpack.c.l.s4 %v1624_v52 }
0x135a   :  { %v1506_v54 = vpop.eup %1505 }
0x135b   :  { %v1508_v55 = vpop.eup %1507  ;;  %966 = vrot.lane.b32.xlu0 %v1506_v54, %s1617_s27 }
0x135c   :  { %968 = vrot.lane.b32.xlu1 %v1508_v55, %s1617_s27 }
0x13cd   :  { %v967_v56 = vpop.permute.xlu0 %966 }
0x13ce   :  { %v969_v57 = vpop.permute.xlu1 %968  ;;  %v972_v59 = vmul.f32 %v1502_v37, %v967_v56 }
0x13cf   :  { %v973_v60 = vmul.f32 %v1504_v39, %v969_v57 }
0x13d0   :  { %v974_v61 = vpack.c.bf16 %v972_v59, %v972_v59  ;;  %v1197_v62 = vrot.slane %v972_v59, 2 }
0x13d1   :  { %v975_v63 = vpack.c.bf16 %v973_v60, %v973_v60  ;;  %v1198_v1 = vrot.slane %v973_v60, 1 }
0x13d2   :  { %v978_v3 = vunpack.c.l.b16 %v974_v61 }
0x13d3   :  { %v979_v5 = vunpack.c.l.b16 %v975_v63  ;;  %v1199_v6 = vsel %vm1183_vm4, %v1198_v1, %v1197_v62 }
0x13d4   :  { %v980_v7 = vrot.slane %v978_v3, 6 }
0x13d5   :  { %v981_v8 = vrot.slane %v979_v5, 5 }
0x13d7   :  { %v982_v9 = vsel %vm275_vm3, %v981_v8, %v980_v7 }
0x13d8   :  { %v983_v10 = vpack.c.b16 %v982_v9, %v982_v9 }
0x13da   :  { %984 = vrot.lane.b32.xlu0 %v983_v10, %s1622_s2 }
0x144c   :  { %v985_v11 = vpop.permute.xlu0 %984 }
0x144d   :  { %1404 = vmatmul.mubr.msk.bf16.vlgmr.msra.gmra.mrb[16].mxu0 %vm101_vm2, %v985_v11 }
0x1520   :  { %v1023_v14 = vpop.f32.mrb[16].mxu0 }
0x1521   :  { %v1030_v15 = vrot.slane %v1023_v14, 1  ;;  %v1031_v16 = vrot.slane %v1023_v14, 2  ;;  %v1405_v17 = vpop.f32.mrb[17].mxu0 }
0x1522   :  { %v1026_v18 = vpop.f32.mrb[18].mxu0 }
0x1523   :  { %v1034_v20 = vadd.f32 %v1030_v15, %v1742_v12  ;;  %v1035_v21 = vadd.f32 %v1031_v16, %v1745_v19  ;;  %v1406_v22 = vpop.f32.mrb[19].mxu0  ;;  %v1174_v15 = vld [vmem:[#allocation10] sm:$0x1] }
0x1525   :  { %v1302_v23 = vmul.f32 -1.442695, %v1034_v20  ;;  %v1303_v25 = vmul.f32 -1.442695, %v1035_v21  ;;  %v1177_v20 = vld [vmem:[#allocation10 + $0x1] sm:$0x1] }
0x1527   :  { %1509 = vpow2.f32 %v1302_v23 }
0x1528   :  { %1511 = vpow2.f32 %v1303_v25 }
0x1531   :  { %v1510_v26 = vpop.eup %1509 }
0x1532   :  { %v1512_v27 = vpop.eup %1511  ;;  %v1042_v28 = vadd.f32 1.0, %v1510_v26 }
0x1533   :  { %v1043_v29 = vadd.f32 1.0, %v1512_v27 }
0x1534   :  { %1513 = vrcp.f32 %v1042_v28 }
0x1535   :  { %1515 = vrcp.f32 %v1043_v29 }
0x153e   :  { %v1514_v30 = vpop.eup %1513 }
0x153f   :  { %v1516_v32 = vpop.eup %1515  ;;  %v1048_v33 = vmul.f32 2.0, %v1514_v30  ;;  %v1058_v2 = vmul.f32 %v1514_v30, %v1054_v40 }
0x1540   :  { %v1049_v34 = vmul.f32 2.0, %v1516_v32  ;;  %v1059_v42 = vmul.f32 %v1516_v32, %v1055_v41 }
0x1541   :  { %v1304_v35 = vadd.f32 -1.0, %v1048_v33 }
0x1542   :  { %v1305_v36 = vadd.f32 -1.0, %v1049_v34 }
0x1543   :  { %1062 = vrot.lane.b32.xlu0 %v1304_v35, %s1617_s27 }
0x1544   :  { %1064 = vrot.lane.b32.xlu1 %v1305_v36, %s1617_s27 }
0x15b5   :  { %v1063_v12 = vpop.permute.xlu0 %1062 }
0x15b6   :  { %v1065_v19 = vpop.permute.xlu1 %1064  ;;  %v1068_v37 = vmul.f32 %v1514_v30, %v1063_v12 }
0x15b7   :  { %v1069_v39 = vmul.f32 %v1516_v32, %v1065_v19 }
0x15b8   :  { %1072 = vrot.lane.b32.xlu0 %v1068_v37, %s1622_s2 }
0x15b9   :  { %1074 = vrot.lane.b32.xlu1 %v1069_v39, %s1622_s2 }
0x162a   :  { %v1073_v43 = vpop.permute.xlu0 %1072 }
0x162b   :  { %v1075_v0 = vpop.permute.xlu1 %1074  ;;  %v1078_v4 = vadd.f32 %v1073_v43, %v1058_v2 }
0x162c   :  { %v1079_v44 = vadd.f32 %v1075_v0, %v1059_v42 }
0x162d   :  { %1517 = vtanh.f32 %v1078_v4 }
0x162e   :  { %1519 = vtanh.f32 %v1079_v44  ;;  %v1107_v56 = vrot.slane %v1079_v44, 7 }
0x1637   :  { %v1518_v45 = vpop.eup %1517 }
0x1638   :  { %v1520_v47 = vpop.eup %1519  ;;  %1084 = vrot.lane.b32.xlu0 %v1518_v45, %s1617_s27 }
0x1639   :  { %1086 = vrot.lane.b32.xlu1 %v1520_v47, %s1617_s27 }
0x163c   :  { %1127 = vrot.lane.b32.xlu0 %v1786_v46, %s1617_s27  ;;  %v1154_v46 = vlaneseq }
0x163d   :  { %1120 = vrot.lane.b32.xlu1 %v1761_v58, %s1622_s2 }
0x1640   :  { %1185 = vrot.lane.b32.xlu0 %v1868_v24, %s1622_s2  ;;  %v1153_v24 = vunpack.c.0.s8 %v1152_v53 }
0x1641   :  { %1135 = vrot.lane.b32.xlu1 %v1813_v38, %s1623_s3  ;;  %v1155_v38 = vshrl.u32 %v1154_v46, 7 }
0x1643   :  { %v1156_v60 = vsub.s32 %v1153_v24, %v1155_v38 }
0x1644   :  { %1200 = vrot.lane.b32.xlu0 %v1199_v6, %s1623_s3 }
0x1645   :  { %1192 = vrot.lane.b32.xlu1 %v1889_v13, %s1617_s27  ;;  %s1625_s27 = smov [#allocation10]  }
0x1646   :  { %s1246_s28 = sshll.u32 %s1625_s27, 4  ;;  %s1247_s28 = int_to_ptr.vmem [resolvable:$true] %s1246_s28 }
0x1647   :  { %s1587_s29 = scalar_lea.vmem %s1247_s28, 32  ;;  %p1592_p11 = scmp.lt.s32.totalorder %s1247_s28, %s1247_s28 }
0x1648   :  { %p1588_p10 = scmp.ne.s32.totalorder %s1247_s28, %s1587_s29  ;;  %p1593_p12 = scmp.lt.s32.totalorder %s1587_s29, %s1587_s29 }
0x164a   :  { %p1594_p13 = por %p1593_p12, %p1592_p11 }
0x164c   :  { %p1595_p0 = pnand %p1594_p13, %p1588_p10 }
0x16aa   :  { %v1085_v48 = vpop.permute.xlu0 %1084 }
0x16ab   :  { %v1087_v49 = vpop.permute.xlu1 %1086  ;;  %v1090_v50 = vmul.f32 %v1514_v30, %v1085_v48 }
0x16ac   :  { %v1091_v51 = vmul.f32 %v1516_v32, %v1087_v49 }
0x16ad   :  { %1095 = vrot.lane.b32.xlu1 %v1090_v50, %s1622_s2  ;;  %v1203_v63 = vrot.slane %v1090_v50, 3 }
0x16ae   :  { %v1094_v58 = vrot.slane %v1091_v51, 7  ;;  %v1128_v54 = vpop.permute.xlu0 %1127  ;;  %v1204_v62 = vrot.slane %v1091_v51, 2 }
0x16af   :  { %v1121_v55 = vpop.permute.xlu1 %1120 }
0x16b0   :  { %1097 = vrot.lane.b32.xlu0 %v1094_v58, %s1622_s2  ;;  %v1144_v57 = vsel %vm101_vm2, %v1121_v55, %v1128_v54  ;;  %v1205_v9 = vsel %vm1183_vm4, %v1204_v62, %v1203_v63 }
0x16b1   :  { %1108 = vrot.lane.b32.xlu1 %v1078_v4, %s1623_s3 }
0x16b2   :  { %v1186_v13 = vpop.permute.xlu0 %1185 }
0x16b3   :  { %v1136_v59 = vpop.permute.xlu1 %1135 }
0x16b4   :  { %v1146_v61 = vsel %vm1145_vm5, %v1144_v57, %v1136_v59  ;;  %1110 = vrot.lane.b32.xlu0 %v1107_v56, %s1623_s3 }
0x16b5   :  { %v1148_v1 = vsel %vm1147_vm6, %v1146_v61, %v1841_v31 }
0x16b6   :  { %v1149_v3 = vpack.c.bf16 %v1148_v1, %v1148_v1  ;;  %v1201_v5 = vpop.permute.xlu0 %1200 }
0x16b7   :  { %v1193_v6 = vpop.permute.xlu1 %1192 }
0x16b8   :  { %v1157_v7 = vrot.slane %v1149_v3, %v1156_v60  ;;  %v1207_v8 = vsel %vm101_vm2, %v1186_v13, %v1193_v6 }
0x16b9   :  { %v1208_v10 = vsel %vm1145_vm5, %v1207_v8, %v1201_v5 }
0x16ba   :  { %v1164_v11 = vrot.slane %v1157_v7, %v1156_v60  ;;  %v1209_v14 = vsel %vm1147_vm6, %v1208_v10, %v1205_v9 }
0x16bb   :  { %v1210_v16 = vpack.c.bf16 %v1209_v14, %v1209_v14 }
0x16bc   :  { %v1166_v31 = vunpack.i.h.s16 %v1164_v11  ;;  %v1306_v17 = vpack.i.b16 %v1164_v11, %v1164_v11 }
0x16bd   :  { %v1218_v18 = vrot.slane %v1210_v16, %v1156_v60 }
0x16be   :  { %v1168_v21 = vpack.i.b16 %v1166_v31, %v1166_v31  ;;  %v1175_v22 = vsel %vm1173_vm9, %v1306_v17, %v1174_v15 }
0x16bf   :  { %1176 = vst [vmem:[#allocation10] sm:$0x1] %v1175_v22  ;;  %v1225_v23 = vrot.slane %v1218_v18, %v1156_v60 }
0x16c0   :  { %v1178_v25 = vsel %vm1173_vm9, %v1168_v21, %v1177_v20 }
0x16c1   :  { %v1226_v26 = vcombine.high %v1225_v23, %v1225_v23  ;;  %1179 = vst [vmem:[#allocation10 + $0x1] sm:$0x1] %v1178_v25 }
0x16c3   :  { %v1228_v27 = vunpack.i.h.s16 %v1226_v26  ;;  %v1307_v28 = vpack.i.b16 %v1226_v26, %v1226_v26 }
0x16c5   :  { %v1230_v30 = vpack.i.b16 %v1228_v27, %v1228_v27 }
0x16c6   :  { %v1235_v29 = vld [vmem:[#allocation10] sm:$0x1] }
0x16c7   :  { %v1236_v32 = vsel %vm1234_vm11, %v1307_v28, %v1235_v29 }
0x16c8   :  { %1237 = vst [vmem:[#allocation10] sm:$0x1] %v1236_v32  ;;  %v1238_v33 = vld [vmem:[#allocation10 + $0x1] sm:$0x1] }
0x16c9   :  { %v1239_v34 = vsel %vm1234_vm11, %v1230_v30, %v1238_v33 }
0x16ca   :  { %1240 = vst [vmem:[#allocation10 + $0x1] sm:$0x1] %v1239_v34 }
0x16cb   :  { %1598 = shalt.err (!%p1595_p0)
}
0x16cc   :  { %s1599_s6 = scalar_lea.hbm %s1951_s4, 32 }
0x16cd   :  { %p1600_p1 = scmp.ne.s32.totalorder %s1951_s4, %s1599_s6  ;;  %p1603_p2 = scmp.lt.u32.totalorder %s1599_s6, %s1951_s4 }
0x16cf   :  { %p1605_p3 = pnand %p1603_p2, %p1600_p1 }
0x16d1   :  { %1608 = shalt.err (!%p1605_p3)
}
0x16d2   :  { %s1626_s11 = smov 16   ;;  %s1627_s12 = smov 1   ;;  %vm1101_vm12 = vcmask 261127   ;;  %vm1103_vm13 = vcmask 253952  }
0x16d3   :  { %1252 = dma.vmem_to_hbm [thread:$0]  %s1247_s28, 32, %s1951_s4, [#allocation6], %s1626_s11, %s1626_s11, %s1627_s12  }
0x171f   :  { %v1096_v35 = vpop.permute.xlu1 %1095 }
0x1720   :  { %1102 = vst.msk [vmem:[#allocation2 - $0x7] sm:$0x80] %vm1101_vm12, %v1096_v35 }
0x1722   :  { %v1098_v36 = vpop.permute.xlu0 %1097 }
0x1723   :  { %1104 = vst.msk [vmem:[#allocation2 + $0x1] sm:$0x1] %vm1103_vm13, %v1098_v36  ;;  %v1109_v12 = vpop.permute.xlu1 %1108 }
0x1724   :  { %1114 = vst.msk [vmem:[#allocation3 - $0x7] sm:$0x80] %vm1101_vm12, %v1109_v12 }
0x1726   :  { %v1111_v19 = vpop.permute.xlu0 %1110 }
0x1727   :  { %1115 = vst.msk [vmem:[#allocation3 + $0x1] sm:$0x1] %vm1103_vm13, %v1111_v19 }
0x1728   :  { %1613 = dma.done.wait [#allocation6], 32  }
0x1729   :  { %1614 = vsyncadd [#allocation6], 4294967264 }
0x172a   :  { %1256 = vsyncpa [#allocation5], 1 }
0x172b   :  { %1257 = vsyncpa [#allocation8], 1 }
0x172c   :  { %1258 = vsyncpa [#allocation6], 1 }

</bundles_post_ra>
